<compile_context>
chip_gen: v6e
topology: v6e:2x2x1
jax: 0.10.0
libtpu: 0.0.40
codegen_flags: <defaults>
</compile_context>

<pallas_src>
import functools

import jax
import jax.numpy as jnp
from jax.experimental import pallas as pl
from jax.experimental.pallas import tpu as pltpu

LANE = 128


def _round_up(x, m):
    return (x + m - 1) // m * m


def _num_tensorcores():
    """Best-effort TensorCore count per chip (v5e/v6e -> 1, v7x -> 2).

    Falls back to 1 (always-correct: grid=(1,), optimal on single-TC chips)."""
    try:
        info = pltpu.get_tpu_info()
        for attr in ("num_cores", "num_tensorcores", "tensorcore_count",
                     "cores_per_chip", "num_cores_per_chip"):
            v = getattr(info, attr, None)
            if isinstance(v, int) and v > 0:
                return v
    except Exception:
        pass
    try:
        v = getattr(jax.devices()[0], "num_cores", None)
        if isinstance(v, int) and v > 0:
            return v
    except Exception:
        pass
    return 1


def _choose_tiling(batch, n_cores, max_tm):
    """Pick (tm, padded_batch).

    Row alignment: 16 keeps bf16 vregs fully packed on the sublane axis; once
    the batch is large we align to 256 so MXU passes are full. Single-TC chips
    get a single grid step; multi-TC chips get one step per core (so
    dimension_semantics=("parallel",) actually uses both cores)."""
    align = 256 if batch >= 256 else 16
    max_tm = max(align, max_tm // align * align)
    bp = _round_up(batch, align)
    if n_cores <= 1:
        tm = min(bp, max_tm)
    else:
        per_core = pl.cdiv(bp, n_cores)
        tm = min(_round_up(per_core, align), max_tm)
    bp = _round_up(bp, tm)
    return tm, bp


def mlp_kernel(x_ref, w0_ref, b0_ref, w1_ref, b1_ref, w2_ref, b2_ref, o_ref):
    # x: (TM, IN) f32 -> cast to bf16 in-kernel (avoids a separate wrapper pass).
    # Weights: bf16, lane-padded. Biases: f32, lane-padded.
    # Three MXU matmuls with f32 accumulation; bias-add + ReLU on the f32 VPU.
    x = x_ref[...].astype(jnp.bfloat16)

    # Layer 0: Linear -> ReLU -> (Dropout == identity in eval)
    h = jnp.dot(x, w0_ref[...], preferred_element_type=jnp.float32) + b0_ref[...]
    h = jnp.maximum(h, 0.0)

    # Layer 1: Linear -> ReLU -> (Dropout == identity in eval)
    h = jnp.dot(h.astype(jnp.bfloat16), w1_ref[...],
                preferred_element_type=jnp.float32) + b1_ref[...]
    h = jnp.maximum(h, 0.0)

    # Output layer: Linear (no activation). Lane-dense bf16 store.
    o_ref[...] = (
        jnp.dot(h.astype(jnp.bfloat16), w2_ref[...],
                preferred_element_type=jnp.float32) + b2_ref[...]
    ).astype(o_ref.dtype)


def prepare_params(params):
    """One-time (outside the hot path): zero-pad every out_features dim up to a
    multiple of 128 and cast weights to bf16 (biases stay f32 for the VPU
    epilogue). Zero columns + zero bias => padded hidden units are ReLU(0) = 0
    and contribute nothing downstream; padded logit columns are sliced off in
    the wrapper."""
    (w0, b0), (w1, b1), (w2, b2) = params
    in_dim = w0.shape[0]
    num_classes = w2.shape[1]
    h0p = _round_up(w0.shape[1], LANE)
    h1p = _round_up(w1.shape[1], LANE)
    cp = _round_up(num_classes, LANE)

    def pad2(a, rows, cols):
        return jnp.pad(a, ((0, rows - a.shape[0]), (0, cols - a.shape[1])))

    arrays = (
        pad2(w0, in_dim, h0p).astype(jnp.bfloat16), pad2(b0, 1, h0p),
        pad2(w1, h0p, h1p).astype(jnp.bfloat16), pad2(b1, 1, h1p),
        pad2(w2, h1p, cp).astype(jnp.bfloat16), pad2(b2, 1, cp),
    )
    return {"arrays": arrays, "num_classes": num_classes}


def classifier_forward(x, prepared, *, max_tm=4096):
    """x: [B, input_dim] float32. Returns logits [B, num_classes] float32."""
    w0p, b0p, w1p, b1p, w2p, b2p = prepared["arrays"]
    num_classes = prepared["num_classes"]
    B, in_dim = x.shape
    h0 = w0p.shape[1]
    h1 = w1p.shape[1]
    cp = w2p.shape[1]

    n_cores = _num_tensorcores()
    tm, bp = _choose_tiling(B, n_cores, max_tm)
    if bp != B:
        x = jnp.pad(x, ((0, bp - B), (0, 0)))

    grid = (bp // tm,)

    flops = 2 * bp * (in_dim * h0 + h0 * h1 + h1 * cp)
    bytes_accessed = (
        bp * in_dim * 4                                   # x (f32 in)
        + sum(int(a.size) * a.dtype.itemsize
              for a in (w0p, b0p, w1p, b1p, w2p, b2p))    # params
        + bp * cp * 2                                     # logits (bf16 out)
    )

    # Weights/biases: constant index_map -> DMA'd once, VMEM-resident.
    const = lambda arr: pl.BlockSpec(arr.shape, lambda i: (0, 0))

    out = pl.pallas_call(
        mlp_kernel,
        out_shape=jax.ShapeDtypeStruct((bp, cp), jnp.bfloat16),
        grid=grid,
        in_specs=[
            pl.BlockSpec((tm, in_dim), lambda i: (i, 0)),  # x: tiled over batch
            const(w0p), const(b0p),
            const(w1p), const(b1p),
            const(w2p), const(b2p),
        ],
        out_specs=pl.BlockSpec((tm, cp), lambda i: (i, 0)),
        compiler_params=pltpu.CompilerParams(
            dimension_semantics=("parallel",),      # v7x: shard batch over 2 TCs
            vmem_limit_bytes=32 * 1024 * 1024,      # safe on v5e/v6e/v7x
        ),
        cost_estimate=pl.CostEstimate(
            flops=flops, transcendentals=0, bytes_accessed=bytes_accessed),
    )(x, w0p, b0p, w1p, b1p, w2p, b2p)

    # Strip batch padding / padded logit columns; present f32 logits.
    return out[:B, :num_classes].astype(jnp.float32)


def init_params(key, input_dim, hidden_dims, num_classes):
    """Deterministic Kaiming-uniform-ish init matching nn.Linear shapes
    (weights stored as [in, out], i.e. transposed from PyTorch's [out, in])."""
    dims = [input_dim] + list(hidden_dims) + [num_classes]
    params = []
    for i in range(len(dims) - 1):
        key, kw, kb = jax.random.split(key, 3)
        fan_in, fan_out = dims[i], dims[i + 1]
        bound = 1.0 / jnp.sqrt(fan_in)
        W = jax.random.uniform(kw, (fan_in, fan_out), jnp.float32, -bound, bound)
        b = jax.random.uniform(kb, (1, fan_out), jnp.float32, -bound, bound)
        params.append((W, b))
    return params


if __name__ == "__main__":
    key = jax.random.PRNGKey(0)

    # Shapes consistent with the module's forward (x: [B, input_dim]).
    batch = 512          # 1 grid step on v5e/v6e, 2 steps (one per TC) on v7x
    input_dim = 32
    hidden_dims = (64, 48)   # config['model']['out_features_0'/'out_features_1']
    num_classes = 10

    key, kx = jax.random.split(key)
    x = jax.random.normal(kx, (batch, input_dim), jnp.float32)

    params = init_params(key, input_dim, hidden_dims, num_classes)
    prepared = prepare_params(params)          # one-time pad + bf16 cast

    fwd = jax.jit(functools.partial(classifier_forward, prepared=prepared))
    out = fwd(x)
    jax.block_until_ready(out)

    # Cross-check against a plain-JAX reference using the same math as the
    # kernel: bf16 matmul inputs, f32 accumulation, f32 bias-add/ReLU, final
    # bf16 rounding of the logits (kernel output dtype).
    h = x.astype(jnp.bfloat16).astype(jnp.float32)
    for i, (W, b) in enumerate(params):
        Wb = W.astype(jnp.bfloat16).astype(jnp.float32)
        h = jnp.dot(h, Wb, precision=jax.lax.Precision.HIGHEST) + b
        if i < len(params) - 1:
            h = jnp.maximum(h, 0.0)
            h = h.astype(jnp.bfloat16).astype(jnp.float32)
    ref = h.astype(jnp.bfloat16).astype(jnp.float32)

    assert out.shape == (batch, num_classes)
    max_err = float(jnp.max(jnp.abs(out - ref)))
    assert jnp.allclose(out, ref, atol=2e-2, rtol=2e-2), max_err

    print("KERNEL_OK")
</pallas_src>

<mosaic_0001>
module attributes {stable_mosaic.version = 11 : i64} {
  func.func @mlp_kernel(%arg0: i32, %arg1: memref<512x32xf32, #tpu.memory_space<vmem>>, %arg2: memref<32x128xbf16, #tpu.memory_space<vmem>>, %arg3: memref<1x128xf32, #tpu.memory_space<vmem>>, %arg4: memref<128x128xbf16, #tpu.memory_space<vmem>>, %arg5: memref<1x128xf32, #tpu.memory_space<vmem>>, %arg6: memref<128x128xbf16, #tpu.memory_space<vmem>>, %arg7: memref<1x128xf32, #tpu.memory_space<vmem>>, %arg8: memref<512x128xbf16, #tpu.memory_space<vmem>>) attributes {dimension_semantics = [#tpu.dimension_semantics<parallel>], iteration_bounds = array<i64: 1>, scalar_prefetch = 0 : i64, scratch_operands = 0 : i64, tpu.core_type = #tpu.core_type<tc>, window_params = [{transform_indices = @transform_0, window_bounds = array<i64: 512, 32>}, {pipeline_mode = #tpu.pipeline_mode<synchronous>, transform_indices = @transform_1, window_bounds = array<i64: 32, 128>}, {pipeline_mode = #tpu.pipeline_mode<synchronous>, transform_indices = @transform_2, window_bounds = array<i64: 1, 128>}, {pipeline_mode = #tpu.pipeline_mode<synchronous>, transform_indices = @transform_3, window_bounds = array<i64: 128, 128>}, {pipeline_mode = #tpu.pipeline_mode<synchronous>, transform_indices = @transform_4, window_bounds = array<i64: 1, 128>}, {pipeline_mode = #tpu.pipeline_mode<synchronous>, transform_indices = @transform_5, window_bounds = array<i64: 128, 128>}, {pipeline_mode = #tpu.pipeline_mode<synchronous>, transform_indices = @transform_6, window_bounds = array<i64: 1, 128>}, {transform_indices = @transform_7, window_bounds = array<i64: 512, 128>}]} {
    %c0 = arith.constant 0 : index
    %c0_0 = arith.constant 0 : index
    %0 = vector.load %arg1[%c0, %c0_0] : memref<512x32xf32, #tpu.memory_space<vmem>>, vector<512x32xf32>
    %1 = arith.truncf %0 : vector<512x32xf32> to vector<512x32xbf16>
    %c0_1 = arith.constant 0 : index
    %c0_2 = arith.constant 0 : index
    %2 = vector.load %arg2[%c0_1, %c0_2] : memref<32x128xbf16, #tpu.memory_space<vmem>>, vector<32x128xbf16>
    %cst = arith.constant dense<0.000000e+00> : vector<512x128xf32>
    %3 = tpu.matmul %1, %2, %cst {dimension_numbers = #tpu.dot_dimension_numbers<[1], [0], [0], [1], [0, 0, 1, 1], [], []>} : vector<512x32xbf16>, vector<32x128xbf16>, vector<512x128xf32> -> vector<512x128xf32>
    %c0_3 = arith.constant 0 : index
    %c0_4 = arith.constant 0 : index
    %4 = vector.load %arg3[%c0_3, %c0_4] : memref<1x128xf32, #tpu.memory_space<vmem>>, vector<1x128xf32>
    %5 = vector.broadcast %4 : vector<1x128xf32> to vector<512x128xf32>
    %6 = arith.addf %3, %5 : vector<512x128xf32>
    %cst_5 = arith.constant 0.000000e+00 : f32
    %7 = vector.broadcast %cst_5 : f32 to vector<512x128xf32>
    %8 = arith.maximumf %6, %7 : vector<512x128xf32>
    %9 = arith.truncf %8 : vector<512x128xf32> to vector<512x128xbf16>
    %c0_6 = arith.constant 0 : index
    %c0_7 = arith.constant 0 : index
    %10 = vector.load %arg4[%c0_6, %c0_7] : memref<128x128xbf16, #tpu.memory_space<vmem>>, vector<128x128xbf16>
    %cst_8 = arith.constant dense<0.000000e+00> : vector<512x128xf32>
    %11 = tpu.matmul %9, %10, %cst_8 {dimension_numbers = #tpu.dot_dimension_numbers<[1], [0], [0], [1], [0, 0, 1, 1], [], []>} : vector<512x128xbf16>, vector<128x128xbf16>, vector<512x128xf32> -> vector<512x128xf32>
    %c0_9 = arith.constant 0 : index
    %c0_10 = arith.constant 0 : index
    %12 = vector.load %arg5[%c0_9, %c0_10] : memref<1x128xf32, #tpu.memory_space<vmem>>, vector<1x128xf32>
    %13 = vector.broadcast %12 : vector<1x128xf32> to vector<512x128xf32>
    %14 = arith.addf %11, %13 : vector<512x128xf32>
    %cst_11 = arith.constant 0.000000e+00 : f32
    %15 = vector.broadcast %cst_11 : f32 to vector<512x128xf32>
    %16 = arith.maximumf %14, %15 : vector<512x128xf32>
    %17 = arith.truncf %16 : vector<512x128xf32> to vector<512x128xbf16>
    %c0_12 = arith.constant 0 : index
    %c0_13 = arith.constant 0 : index
    %18 = vector.load %arg6[%c0_12, %c0_13] : memref<128x128xbf16, #tpu.memory_space<vmem>>, vector<128x128xbf16>
    %cst_14 = arith.constant dense<0.000000e+00> : vector<512x128xf32>
    %19 = tpu.matmul %17, %18, %cst_14 {dimension_numbers = #tpu.dot_dimension_numbers<[1], [0], [0], [1], [0, 0, 1, 1], [], []>} : vector<512x128xbf16>, vector<128x128xbf16>, vector<512x128xf32> -> vector<512x128xf32>
    %c0_15 = arith.constant 0 : index
    %c0_16 = arith.constant 0 : index
    %20 = vector.load %arg7[%c0_15, %c0_16] : memref<1x128xf32, #tpu.memory_space<vmem>>, vector<1x128xf32>
    %21 = vector.broadcast %20 : vector<1x128xf32> to vector<512x128xf32>
    %22 = arith.addf %19, %21 : vector<512x128xf32>
    %23 = arith.truncf %22 : vector<512x128xf32> to vector<512x128xbf16>
    %c0_17 = arith.constant 0 : index
    %c0_18 = arith.constant 0 : index
    %24 = vector.load %arg8[%c0_17, %c0_18] : memref<512x128xbf16, #tpu.memory_space<vmem>>, vector<512x128xbf16>
    tpu.vector_store %arg8[%c0_17, %c0_18], %23 {strides = array<i32>} : memref<512x128xbf16, #tpu.memory_space<vmem>>, vector<512x128xbf16>,
    return
  }
  func.func @transform_0(%arg0: i32) -> (i32, i32) {
    %c0_i32 = arith.constant 0 : i32
    %c0_i32_0 = arith.constant 0 : i32
    return %arg0, %c0_i32 : i32, i32
  }
  func.func @transform_1(%arg0: i32) -> (i32, i32) {
    %c0_i32 = arith.constant 0 : i32
    %c0_i32_0 = arith.constant 0 : i32
    %c0_i32_1 = arith.constant 0 : i32
    return %c0_i32, %c0_i32_0 : i32, i32
  }
  func.func @transform_2(%arg0: i32) -> (i32, i32) {
    %c0_i32 = arith.constant 0 : i32
    %c0_i32_0 = arith.constant 0 : i32
    %c0_i32_1 = arith.constant 0 : i32
    return %c0_i32, %c0_i32_0 : i32, i32
  }
  func.func @transform_3(%arg0: i32) -> (i32, i32) {
    %c0_i32 = arith.constant 0 : i32
    %c0_i32_0 = arith.constant 0 : i32
    %c0_i32_1 = arith.constant 0 : i32
    return %c0_i32, %c0_i32_0 : i32, i32
  }
  func.func @transform_4(%arg0: i32) -> (i32, i32) {
    %c0_i32 = arith.constant 0 : i32
    %c0_i32_0 = arith.constant 0 : i32
    %c0_i32_1 = arith.constant 0 : i32
    return %c0_i32, %c0_i32_0 : i32, i32
  }
  func.func @transform_5(%arg0: i32) -> (i32, i32) {
    %c0_i32 = arith.constant 0 : i32
    %c0_i32_0 = arith.constant 0 : i32
    %c0_i32_1 = arith.constant 0 : i32
    return %c0_i32, %c0_i32_0 : i32, i32
  }
  func.func @transform_6(%arg0: i32) -> (i32, i32) {
    %c0_i32 = arith.constant 0 : i32
    %c0_i32_0 = arith.constant 0 : i32
    %c0_i32_1 = arith.constant 0 : i32
    return %c0_i32, %c0_i32_0 : i32, i32
  }
  func.func @transform_7(%arg0: i32) -> (i32, i32) {
    %c0_i32 = arith.constant 0 : i32
    %c0_i32_0 = arith.constant 0 : i32
    return %arg0, %c0_i32 : i32, i32
  }
}

</mosaic_0001>

<bundles_post_ra>
// kernel: classifier_forward.1
= control target key start
LH: loop header
LB: loop body
LE: loop exit
PB: predicated region body
PF: predicated region fallthrough
CT: control target
= control target key end

     0   :  { %vm146_vm0 = vcmask 261120   ;;  %s3185_s1 = inlined_call_operand.vmem [shape: bf16[32,128], index: 1, kind: input, shape index: {}]   ;;  %s3186_s0 = inlined_call_operand.vmem [shape: f32[512,32], index: 0, kind: input, shape index: {}]   ;;  %s3187_s3 = inlined_call_operand.vmem [shape: bf16[128,128], index: 3, kind: input, shape index: {}]   ;;  %s3188_s2 = inlined_call_operand.vmem [shape: f32[1,128], index: 2, kind: input, shape index: {}]   ;;  %s3189_s5 = inlined_call_operand.vmem [shape: bf16[128,128], index: 5, kind: input, shape index: {}]   ;;  %s3190_s4 = inlined_call_operand.vmem [shape: f32[1,128], index: 4, kind: input, shape index: {}]   ;;  %s3191_s6 = inlined_call_operand.vmem [shape: f32[1,128], index: 6, kind: input, shape index: {}]   ;;  %s3192_s7 = inlined_call_operand.vmem [shape: bf16[512,128], index: 7, kind: output, shape index: {}]  }
   0x1   :  { %v2486_v0 = vld [vmem:[%s3185_s1 + $0x8] sm:$0xff]   ;;  %v2487_v1 = vld [vmem:[%s3185_s1] sm:$0xff]   ;;  %v29_v5 = vld [vmem:[%s3186_s0 + $0x10] sm:$0xff] }
   0x2   :  { %2254 = vmatprep.subr.bf16.mxu0 %v2486_v0  ;;  %v27_v2 = vld [vmem:[%s3186_s0] sm:$0xff]  ;;  %v28_v3 = vld [vmem:[%s3186_s0 + $0x8] sm:$0xff]  ;;  %2482 = vmatprep.subr.bf16.mxu1 %v2486_v0  ;;  %v30_v6 = vld [vmem:[%s3186_s0 + $0x18] sm:$0xff] }
   0x3   :  { %2255 = vmatpush3.bf16.msra.mxu0 %v2486_v0  ;;  %v91_v4 = vpack.c.bf16 %v28_v3, %v27_v2  ;;  %2484 = vmatpush3.bf16.msra.mxu1 %v2486_v0  ;;  %v31_v7 = vld [vmem:[%s3186_s0 + $0x20] sm:$0xff]  ;;  %v32_v8 = vld [vmem:[%s3186_s0 + $0x28] sm:$0xff]  ;;  %v92_v9 = vpack.c.bf16 %v30_v6, %v29_v5  ;;  %v33_v11 = vld [vmem:[%s3186_s0 + $0x30] sm:$0xff] }
   0x4   :  { %2256 = vmatprep.subr.bf16.mxu0 %v2487_v1  ;;  %2483 = vmatprep.subr.bf16.mxu1 %v2487_v1  ;;  %v93_v10 = vpack.c.bf16 %v32_v8, %v31_v7  ;;  %v34_v12 = vld [vmem:[%s3186_s0 + $0x38] sm:$0xff]  ;;  %v35_v13 = vld [vmem:[%s3186_s0 + $0x40] sm:$0xff]  ;;  %v36_v14 = vld [vmem:[%s3186_s0 + $0x48] sm:$0xff] }
   0x5   :  { %2258 = vmatprep.mubr.msk.bf16.mxu0 %vm146_vm0, %v91_v4  ;;  %v59_v15 = vld [vmem:[%s3186_s0 + $0x100] sm:$0xff]  ;;  %v60_v16 = vld [vmem:[%s3186_s0 + $0x108] sm:$0xff]  ;;  %v61_v17 = vld [vmem:[%s3186_s0 + $0x110] sm:$0xff]  ;;  %v94_v19 = vpack.c.bf16 %v34_v12, %v33_v11  ;;  %v95_v24 = vpack.c.bf16 %v36_v14, %v35_v13 }
   0x6   :  { %v62_v18 = vld [vmem:[%s3186_s0 + $0x118] sm:$0xff]  ;;  %v107_v20 = vpack.c.bf16 %v60_v16, %v59_v15  ;;  %v63_v22 = vld [vmem:[%s3186_s0 + $0x120] sm:$0xff]  ;;  %v64_v23 = vld [vmem:[%s3186_s0 + $0x128] sm:$0xff] }
   0x7   :  { %2257 = vmatpush3.bf16.msra.mxu0 %v2487_v1  ;;  %2485 = vmatpush3.bf16.msra.mxu1 %v2487_v1  ;;  %v108_v21 = vpack.c.bf16 %v62_v18, %v61_v17  ;;  %v109_v25 = vpack.c.bf16 %v64_v23, %v63_v22  ;;  %v37_v26 = vld [vmem:[%s3186_s0 + $0x50] sm:$0xff]  ;;  %v66_v28 = vld [vmem:[%s3186_s0 + $0x138] sm:$0xff]  ;;  %v67_v30 = vld [vmem:[%s3186_s0 + $0x140] sm:$0xff] }
   0x8   :  { %2290 = vmatprep.mubr.msk.bf16.mxu1 %vm146_vm0, %v107_v20  ;;  %v65_v27 = vld [vmem:[%s3186_s0 + $0x130] sm:$0xff]  ;;  %v38_v29 = vld [vmem:[%s3186_s0 + $0x58] sm:$0xff]  ;;  %v68_v31 = vld [vmem:[%s3186_s0 + $0x148] sm:$0xff] }
   0x9   :  { %v39_v32 = vld [vmem:[%s3186_s0 + $0x60] sm:$0xff]  ;;  %v40_v33 = vld [vmem:[%s3186_s0 + $0x68] sm:$0xff]  ;;  %v110_v34 = vpack.c.bf16 %v66_v28, %v65_v27  ;;  %v96_v35 = vpack.c.bf16 %v38_v29, %v37_v26  ;;  %v111_v36 = vpack.c.bf16 %v68_v31, %v67_v30  ;;  %v69_v38 = vld [vmem:[%s3186_s0 + $0x150] sm:$0xff] }
   0xa   :  { %2259 = vmatmul.mubr.msk.bf16.vlgmr.msra.gmra.mxu0 %vm146_vm0, %v92_v9  ;;  %2291 = vmatmul.mubr.msk.bf16.vlgmr.msra.gmra.mxu1 %vm146_vm0, %v108_v21  ;;  %v97_v37 = vpack.c.bf16 %v40_v33, %v39_v32  ;;  %v70_v39 = vld [vmem:[%s3186_s0 + $0x158] sm:$0xff]  ;;  %v41_v41 = vld [vmem:[%s3186_s0 + $0x70] sm:$0xff]  ;;  %v43_v44 = vld [vmem:[%s3186_s0 + $0x80] sm:$0xff] }
   0xb   :  { %2262 = vmatprep.mubr.msk.bf16.mxu0 %vm146_vm0, %v93_v10  ;;  %2294 = vmatprep.mubr.msk.bf16.mxu1 %vm146_vm0, %v109_v25  ;;  %v2488_v40 = vld [vmem:[%s3187_s3 + $0x38] sm:$0xff]   ;;  %v2489_v43 = vld [vmem:[%s3187_s3 + $0x30] sm:$0xff]   ;;  %v71_v45 = vld [vmem:[%s3186_s0 + $0x160] sm:$0xff]  ;;  %v112_v48 = vpack.c.bf16 %v70_v39, %v69_v38 }
   0xc   :  { %v42_v42 = vld [vmem:[%s3186_s0 + $0x78] sm:$0xff]  ;;  %v72_v46 = vld [vmem:[%s3186_s0 + $0x168] sm:$0xff]  ;;  %2322 = vmatprep.subr.bf16.mxu1 %v2488_v40  ;;  %v2491_v53 = vld [vmem:[%s3187_s3 + $0x20] sm:$0xff]  }
   0xd   :  { %v44_v47 = vld [vmem:[%s3186_s0 + $0x88] sm:$0xff]  ;;  %2323 = vmatpush3.bf16.msra.mxu1 %v2488_v40  ;;  %v98_v50 = vpack.c.bf16 %v42_v42, %v41_v41  ;;  %v113_v51 = vpack.c.bf16 %v72_v46, %v71_v45  ;;  %v45_v54 = vld [vmem:[%s3186_s0 + $0x90] sm:$0xff]  ;;  %v74_v56 = vld [vmem:[%s3186_s0 + $0x178] sm:$0xff] }
   0xe   :  { %2324 = vmatprep.subr.bf16.mxu1 %v2489_v43  ;;  %v2490_v49 = vld [vmem:[%s3187_s3 + $0x28] sm:$0xff]   ;;  %v99_v52 = vpack.c.bf16 %v44_v47, %v43_v44  ;;  %v73_v55 = vld [vmem:[%s3186_s0 + $0x170] sm:$0xff]  ;;  %v46_v57 = vld [vmem:[%s3186_s0 + $0x98] sm:$0xff] }
   0xf   :  { %v75_v58 = vld [vmem:[%s3186_s0 + $0x180] sm:$0xff]  ;;  %v76_v59 = vld [vmem:[%s3186_s0 + $0x188] sm:$0xff]  ;;  %v114_v62 = vpack.c.bf16 %v74_v56, %v73_v55  ;;  %v2492_v63 = vld [vmem:[%s3187_s3 + $0x18] sm:$0xff]   ;;  %v100_v0 = vpack.c.bf16 %v46_v57, %v45_v54 }
  0x10   :  { %v47_v60 = vld [vmem:[%s3186_s0 + $0xa0] sm:$0xff]  ;;  %v48_v61 = vld [vmem:[%s3186_s0 + $0xa8] sm:$0xff]  ;;  %v115_v1 = vpack.c.bf16 %v76_v59, %v75_v58  ;;  %v2493_v3 = vld [vmem:[%s3187_s3 + $0x10] sm:$0xff]  }
  0x11   :  { %2325 = vmatpush3.bf16.msra.mxu1 %v2489_v43  ;;  %v101_v2 = vpack.c.bf16 %v48_v61, %v47_v60  ;;  %v49_v4 = vld [vmem:[%s3186_s0 + $0xb0] sm:$0xff]  ;;  %v78_v6 = vld [vmem:[%s3186_s0 + $0x198] sm:$0xff]  ;;  %v79_v8 = vld [vmem:[%s3186_s0 + $0x1a0] sm:$0xff] }
  0x12   :  { %2263 = vmatmul.mubr.msk.bf16.gmra.mxu0 %vm146_vm0, %v94_v19  ;;  %2295 = vmatmul.mubr.msk.bf16.gmra.mxu1 %vm146_vm0, %v110_v34  ;;  %v77_v5 = vld [vmem:[%s3186_s0 + $0x190] sm:$0xff]  ;;  %v50_v7 = vld [vmem:[%s3186_s0 + $0xb8] sm:$0xff]  ;;  %v80_v9 = vld [vmem:[%s3186_s0 + $0x1a8] sm:$0xff] }
  0x13   :  { %2266 = vmatprep.mubr.msk.bf16.mxu0 %vm146_vm0, %v95_v24  ;;  %2298 = vmatprep.mubr.msk.bf16.mxu1 %vm146_vm0, %v111_v36  ;;  %v51_v10 = vld [vmem:[%s3186_s0 + $0xc0] sm:$0xff]  ;;  %v52_v11 = vld [vmem:[%s3186_s0 + $0xc8] sm:$0xff]  ;;  %v116_v12 = vpack.c.bf16 %v78_v6, %v77_v5  ;;  %v102_v14 = vpack.c.bf16 %v50_v7, %v49_v4  ;;  %v117_v15 = vpack.c.bf16 %v80_v9, %v79_v8  ;;  %v53_v17 = vld [vmem:[%s3186_s0 + $0xd0] sm:$0xff] }
  0x14   :  { %2326 = vmatprep.subr.bf16.mxu1 %v2490_v49  ;;  %v2494_v13 = vld [vmem:[%s3187_s3 + $0x8] sm:$0xff]   ;;  %v103_v16 = vpack.c.bf16 %v52_v11, %v51_v10  ;;  %v81_v18 = vld [vmem:[%s3186_s0 + $0x1b0] sm:$0xff]  ;;  %v82_v19 = vld [vmem:[%s3186_s0 + $0x1b8] sm:$0xff] }
  0x15   :  { %2327 = vmatpush3.bf16.msra.mxu1 %v2490_v49  ;;  %v54_v20 = vld [vmem:[%s3186_s0 + $0xd8] sm:$0xff]  ;;  %v83_v21 = vld [vmem:[%s3186_s0 + $0x1c0] sm:$0xff]  ;;  %v84_v22 = vld [vmem:[%s3186_s0 + $0x1c8] sm:$0xff]  ;;  %v118_v25 = vpack.c.bf16 %v82_v19, %v81_v18 }
  0x16   :  { %2328 = vmatprep.subr.bf16.mxu1 %v2491_v53  ;;  %v55_v23 = vld [vmem:[%s3186_s0 + $0xe0] sm:$0xff]  ;;  %v56_v24 = vld [vmem:[%s3186_s0 + $0xe8] sm:$0xff]  ;;  %v104_v26 = vpack.c.bf16 %v54_v20, %v53_v17  ;;  %v119_v27 = vpack.c.bf16 %v84_v22, %v83_v21  ;;  %v57_v29 = vld [vmem:[%s3186_s0 + $0xf0] sm:$0xff] }
  0x17   :  { %v105_v28 = vpack.c.bf16 %v56_v24, %v55_v23  ;;  %v85_v30 = vld [vmem:[%s3186_s0 + $0x1d0] sm:$0xff]  ;;  %v86_v31 = vld [vmem:[%s3186_s0 + $0x1d8] sm:$0xff]  ;;  %v87_v33 = vld [vmem:[%s3186_s0 + $0x1e0] sm:$0xff] }
  0x18   :  { %v58_v32 = vld [vmem:[%s3186_s0 + $0xf8] sm:$0xff]  ;;  %v88_v34 = vld [vmem:[%s3186_s0 + $0x1e8] sm:$0xff]  ;;  %v89_v38 = vld [vmem:[%s3186_s0 + $0x1f0] sm:$0xff] }
  0x19   :  { %2329 = vmatpush3.bf16.msra.mxu1 %v2491_v53  ;;  %v106_v36 = vpack.c.bf16 %v58_v32, %v57_v29  ;;  %v90_v39 = vld [vmem:[%s3186_s0 + $0x1f8] sm:$0xff]  ;;  %v2495_v41 = vld [vmem:[%s3187_s3] sm:$0xff]   ;;  %v2497_v55 = vld [vmem:[%s3189_s5 + $0x30] sm:$0xff]  }
  0x1a   :  { %2267 = vmatmul.mubr.msk.bf16.gmra.mxu0 %vm146_vm0, %v96_v35  ;;  %2299 = vmatmul.mubr.msk.bf16.gmra.mxu1 %vm146_vm0, %v112_v48  ;;  %v120_v35 = vpack.c.bf16 %v86_v31, %v85_v30  ;;  %v122_v40 = vpack.c.bf16 %v90_v39, %v89_v38  ;;  %v2801_v44 = vld [vmem:[%s3188_s2] ss:$0 sm:$0xff]  ;;  %v2500_v19 = vld [vmem:[%s3189_s5 + $0x18] sm:$0xff]   ;;  %v2501_v29 = vld [vmem:[%s3189_s5 + $0x10] sm:$0xff]  }
  0x1b   :  { %2270 = vmatprep.mubr.msk.bf16.mxu0 %vm146_vm0, %v97_v37  ;;  %2302 = vmatprep.mubr.msk.bf16.mxu1 %vm146_vm0, %v113_v51  ;;  %v121_v37 = vpack.c.bf16 %v88_v34, %v87_v33  ;;  %v2499_v9 = vld [vmem:[%s3189_s5 + $0x20] sm:$0xff]   ;;  %v2502_v38 = vld [vmem:[%s3189_s5 + $0x8] sm:$0xff]  }
  0x1c   :  { %2330 = vmatprep.subr.bf16.mxu1 %v2492_v63 }
  0x1d   :  { %2331 = vmatpush3.bf16.msra.mxu1 %v2492_v63  ;;  %v2498_v63 = vld [vmem:[%s3189_s5 + $0x28] sm:$0xff]  }
  0x1e   :  { %2332 = vmatprep.subr.bf16.mxu1 %v2493_v3 }
  0x21   :  { %2333 = vmatpush3.bf16.msra.mxu1 %v2493_v3 }
  0x22   :  { %2271 = vmatmul.mubr.msk.bf16.gmra.mxu0 %vm146_vm0, %v98_v50  ;;  %2303 = vmatmul.mubr.msk.bf16.gmra.mxu1 %vm146_vm0, %v114_v62 }
  0x23   :  { %2274 = vmatprep.mubr.msk.bf16.mxu0 %vm146_vm0, %v99_v52  ;;  %2306 = vmatprep.mubr.msk.bf16.mxu1 %vm146_vm0, %v115_v1  ;;  %v2496_v52 = vld [vmem:[%s3189_s5 + $0x38] sm:$0xff]  }
  0x24   :  { %2334 = vmatprep.subr.bf16.mxu1 %v2494_v13  ;;  %2402 = vmatprep.subr.bf16.mxu0 %v2496_v52 }
  0x25   :  { %2335 = vmatpush3.bf16.msra.mxu1 %v2494_v13  ;;  %2403 = vmatpush3.bf16.msra.mxu0 %v2496_v52 }
  0x26   :  { %2336 = vmatprep.subr.bf16.mxu1 %v2495_v41  ;;  %2404 = vmatprep.subr.bf16.mxu0 %v2497_v55 }
  0x29   :  { %2337 = vmatpush3.bf16.msra.mxu1 %v2495_v41  ;;  %2405 = vmatpush3.bf16.msra.mxu0 %v2497_v55 }
  0x2a   :  { %2275 = vmatmul.mubr.msk.bf16.gmra.mxu0 %vm146_vm0, %v100_v0  ;;  %2307 = vmatmul.mubr.msk.bf16.gmra.mxu1 %vm146_vm0, %v116_v12 }
  0x2b   :  { %2278 = vmatprep.mubr.msk.bf16.mxu0 %vm146_vm0, %v101_v2  ;;  %2310 = vmatprep.mubr.msk.bf16.mxu1 %vm146_vm0, %v117_v15 }
  0x2c   :  { %2406 = vmatprep.subr.bf16.mxu0 %v2498_v63 }
  0x2d   :  { %2407 = vmatpush3.bf16.msra.mxu0 %v2498_v63 }
  0x2e   :  { %2408 = vmatprep.subr.bf16.mxu0 %v2499_v9 }
  0x31   :  { %2409 = vmatpush3.bf16.msra.mxu0 %v2499_v9 }
  0x32   :  { %2279 = vmatmul.mubr.msk.bf16.gmra.mxu0 %vm146_vm0, %v102_v14  ;;  %2311 = vmatmul.mubr.msk.bf16.gmra.mxu1 %vm146_vm0, %v118_v25 }
  0x33   :  { %2282 = vmatprep.mubr.msk.bf16.mxu0 %vm146_vm0, %v103_v16  ;;  %2314 = vmatprep.mubr.msk.bf16.mxu1 %vm146_vm0, %v119_v27 }
  0x34   :  { %2410 = vmatprep.subr.bf16.mxu0 %v2500_v19 }
  0x35   :  { %2411 = vmatpush3.bf16.msra.mxu0 %v2500_v19 }
  0x36   :  { %2412 = vmatprep.subr.bf16.mxu0 %v2501_v29 }
  0x39   :  { %2413 = vmatpush3.bf16.msra.mxu0 %v2501_v29 }
  0x3a   :  { %2283 = vmatmul.mubr.msk.bf16.gmra.mxu0 %vm146_vm0, %v104_v26  ;;  %2315 = vmatmul.mubr.msk.bf16.gmra.mxu1 %vm146_vm0, %v120_v35 }
  0x3b   :  { %2286 = vmatprep.mubr.msk.bf16.mxu0 %vm146_vm0, %v105_v28  ;;  %2318 = vmatprep.mubr.msk.bf16.mxu1 %vm146_vm0, %v121_v37 }
  0x3c   :  { %2414 = vmatprep.subr.bf16.mxu0 %v2502_v38 }
  0x3d   :  { %2415 = vmatpush3.bf16.msra.mxu0 %v2502_v38 }
  0x42   :  { %2287 = vmatmul.mubr.msk.bf16.gmra.mxu0 %vm146_vm0, %v106_v36  ;;  %2319 = vmatmul.mubr.msk.bf16.gmra.mxu1 %vm146_vm0, %v122_v40 }
  0xca   :  { %v2260_v42 = vpop.f32.mrf.mxu0  ;;  %v2807_v51 = vpop.f32.mrf.mxu1 }
  0xcb   :  { %v286_v48 = vadd.f32 %v2260_v42, %v2801_v44 }
  0xcc   :  { %v277_v43 = vpop.f32.mrf.mxu0  ;;  %v2815_v58 = vpop.f32.mrf.mxu1 }
  0xcd   :  { %v278_v46 = vadd.f32 %v2801_v44, %v277_v43  ;;  %v534_v59 = vmax.f32 %v286_v48, 0.0 }
  0xce   :  { %v2261_v45 = vpop.f32.mrf.mxu0  ;;  %v2817_v62 = vpop.f32.mrf.mxu1 }
  0xcf   :  { %v289_v47 = vadd.f32 %v2261_v45, %v2801_v44  ;;  %v532_v56 = vmax.f32 %v278_v46, 0.0 }
  0xd0   :  { %v280_v49 = vpop.f32.mrf.mxu0  ;;  %v2824_v4 = vpop.f32.mrf.mxu1 }
  0xd1   :  { %v281_v50 = vadd.f32 %v2801_v44, %v280_v49  ;;  %v535_v53 = vmax.f32 %v289_v47, 0.0 }
  0xd2   :  { %v2264_v54 = vpop.f32.mrf.mxu0  ;;  %v2828_v8 = vpop.f32.mrf.mxu1 }
  0xd3   :  { %v533_v57 = vmax.f32 %v281_v50, 0.0  ;;  %v597_v0 = vpack.c.bf16 %v535_v53, %v534_v59  ;;  %v302_v5 = vadd.f32 %v2264_v54, %v2801_v44 }
  0xd4   :  { %v293_v60 = vpop.f32.mrf.mxu0  ;;  %v2833_v14 = vpop.f32.mrf.mxu1 }
  0xd5   :  { %v596_v61 = vpack.c.bf16 %v533_v57, %v532_v56  ;;  %v294_v2 = vadd.f32 %v2801_v44, %v293_v60  ;;  %v538_v15 = vmax.f32 %v302_v5, 0.0 }
  0xd6   :  { %v2265_v1 = vpop.f32.mrf.mxu0  ;;  %v2835_v18 = vpop.f32.mrf.mxu1 }
  0xd7   :  { %v305_v3 = vadd.f32 %v2265_v1, %v2801_v44  ;;  %2338 = vmatprep.mubr.bf16.mxu1 %v596_v61  ;;  %v536_v12 = vmax.f32 %v294_v2, 0.0 }
  0xd8   :  { %v296_v6 = vpop.f32.mrf.mxu0  ;;  %2339 = vmatmul.mubr.bf16.vlgmr.msra.gmra.mxu1 %v597_v0  ;;  %v2842_v24 = vpop.f32.mrf.mxu1 }
  0xd9   :  { %v297_v7 = vadd.f32 %v2801_v44, %v296_v6  ;;  %v539_v10 = vmax.f32 %v305_v3, 0.0 }
  0xda   :  { %v2268_v11 = vpop.f32.mrf.mxu0  ;;  %v2846_v28 = vpop.f32.mrf.mxu1 }
  0xdb   :  { %v537_v13 = vmax.f32 %v297_v7, 0.0  ;;  %v599_v20 = vpack.c.bf16 %v539_v10, %v538_v15  ;;  %v318_v25 = vadd.f32 %v2268_v11, %v2801_v44 }
  0xdc   :  { %v309_v16 = vpop.f32.mrf.mxu0  ;;  %v2851_v34 = vpop.f32.mrf.mxu1 }
  0xdd   :  { %v598_v17 = vpack.c.bf16 %v537_v13, %v536_v12  ;;  %v310_v22 = vadd.f32 %v2801_v44, %v309_v16  ;;  %v542_v35 = vmax.f32 %v318_v25, 0.0 }
  0xde   :  { %v2269_v21 = vpop.f32.mrf.mxu0  ;;  %v2856_v41 = vpop.f32.mrf.mxu1 }
  0xdf   :  { %v321_v23 = vadd.f32 %v2269_v21, %v2801_v44  ;;  %2342 = vmatprep.mubr.bf16.mxu1 %v598_v17  ;;  %v540_v32 = vmax.f32 %v310_v22, 0.0 }
  0xe0   :  { %v312_v26 = vpop.f32.mrf.mxu0  ;;  %2343 = vmatmul.mubr.bf16.gmra.mxu1 %v599_v20  ;;  %v2862_v50 = vpop.f32.mrf.mxu1 }
  0xe1   :  { %v313_v27 = vadd.f32 %v2801_v44, %v312_v26  ;;  %v543_v30 = vmax.f32 %v321_v23, 0.0 }
  0xe2   :  { %v2272_v31 = vpop.f32.mrf.mxu0  ;;  %v2864_v60 = vpop.f32.mrf.mxu1 }
  0xe3   :  { %v541_v33 = vmax.f32 %v313_v27, 0.0  ;;  %v601_v39 = vpack.c.bf16 %v543_v30, %v542_v35  ;;  %v334_v45 = vadd.f32 %v2272_v31, %v2801_v44 }
  0xe4   :  { %v325_v36 = vpop.f32.mrf.mxu0  ;;  %v2870_v6 = vpop.f32.mrf.mxu1 }
  0xe5   :  { %v600_v37 = vpack.c.bf16 %v541_v33, %v540_v32  ;;  %v326_v42 = vadd.f32 %v2801_v44, %v325_v36  ;;  %v546_v54 = vmax.f32 %v334_v45, 0.0 }
  0xe6   :  { %v2273_v40 = vpop.f32.mrf.mxu0  ;;  %v2872_v16 = vpop.f32.mrf.mxu1 }
  0xe7   :  { %v337_v43 = vadd.f32 %v2273_v40, %v2801_v44  ;;  %2346 = vmatprep.mubr.bf16.mxu1 %v600_v37  ;;  %v544_v52 = vmax.f32 %v326_v42, 0.0 }
  0xe8   :  { %v328_v46 = vpop.f32.mrf.mxu0  ;;  %2347 = vmatmul.mubr.bf16.gmra.mxu1 %v601_v39  ;;  %v2878_v26 = vpop.f32.mrf.mxu1 }
  0xe9   :  { %v329_v47 = vadd.f32 %v2801_v44, %v328_v46  ;;  %v547_v48 = vmax.f32 %v337_v43, 0.0 }
  0xea   :  { %v2276_v49 = vpop.f32.mrf.mxu0  ;;  %v2880_v36 = vpop.f32.mrf.mxu1 }
  0xeb   :  { %v545_v53 = vmax.f32 %v329_v47, 0.0  ;;  %v603_v57 = vpack.c.bf16 %v547_v48, %v546_v54  ;;  %v350_v0 = vadd.f32 %v2276_v49, %v2801_v44  ;;  %v406_v54 = vadd.f32 %v2801_v44, %v2815_v58 }
  0xec   :  { %v341_v55 = vpop.f32.mrf.mxu0  ;;  %v2886_v46 = vpop.f32.mrf.mxu1 }
  0xed   :  { %v602_v56 = vpack.c.bf16 %v545_v53, %v544_v52  ;;  %v342_v61 = vadd.f32 %v2801_v44, %v341_v55  ;;  %v550_v10 = vmax.f32 %v350_v0, 0.0  ;;  %v409_v55 = vadd.f32 %v2801_v44, %v2824_v4 }
  0xee   :  { %v2277_v59 = vpop.f32.mrf.mxu0 }
  0xef   :  { %v353_v63 = vadd.f32 %v2277_v59, %v2801_v44  ;;  %2350 = vmatprep.mubr.bf16.mxu1 %v602_v56  ;;  %v548_v7 = vmax.f32 %v342_v61, 0.0  ;;  %v2892_v59 = vpop.f32.mrf.mxu1  ;;  %v565_v58 = vmax.f32 %v409_v55, 0.0  ;;  %v465_v55 = vadd.f32 %v2872_v16, %v2801_v44 }
  0xf0   :  { %v344_v1 = vpop.f32.mrf.mxu0  ;;  %2351 = vmatmul.mubr.bf16.gmra.mxu1 %v603_v57  ;;  %v481_v16 = vadd.f32 %v2892_v59, %v2801_v44 }
  0xf1   :  { %v345_v2 = vadd.f32 %v2801_v44, %v344_v1  ;;  %v551_v3 = vmax.f32 %v353_v63, 0.0 }
  0xf2   :  { %v2280_v5 = vpop.f32.mrf.mxu0 }
  0xf3   :  { %v549_v9 = vmax.f32 %v345_v2, 0.0  ;;  %v605_v13 = vpack.c.bf16 %v551_v3, %v550_v10  ;;  %v366_v20 = vadd.f32 %v2280_v5, %v2801_v44  ;;  %v564_v2 = vmax.f32 %v406_v54, 0.0 }
  0xf4   :  { %v357_v11 = vpop.f32.mrf.mxu0  ;;  %v462_v54 = vadd.f32 %v2864_v60, %v2801_v44  ;;  %v478_v60 = vadd.f32 %v2880_v36, %v2801_v44 }
  0xf5   :  { %v604_v12 = vpack.c.bf16 %v549_v9, %v548_v7  ;;  %v358_v17 = vadd.f32 %v2801_v44, %v357_v11  ;;  %v554_v30 = vmax.f32 %v366_v20, 0.0  ;;  %v472_v7 = vpop.f32.mrf.mxu1  ;;  %v417_v20 = vadd.f32 %v2817_v62, %v2801_v44 }
  0xf6   :  { %v2281_v15 = vpop.f32.mrf.mxu0  ;;  %v430_v62 = vadd.f32 %v2828_v8, %v2801_v44  ;;  %v446_v8 = vadd.f32 %v2846_v28, %v2801_v44  ;;  %v470_v28 = vadd.f32 %v2801_v44, %v2886_v46 }
  0xf7   :  { %v369_v19 = vadd.f32 %v2281_v15, %v2801_v44  ;;  %2354 = vmatprep.mubr.bf16.mxu1 %v604_v12  ;;  %v552_v27 = vmax.f32 %v358_v17, 0.0  ;;  %v612_v12 = vpack.c.bf16 %v565_v58, %v564_v2  ;;  %v425_v15 = vadd.f32 %v2801_v44, %v2842_v24 }
  0xf8   :  { %v360_v21 = vpop.f32.mrf.mxu0  ;;  %2355 = vmatmul.mubr.bf16.gmra.mxu1 %v605_v13  ;;  %v422_v13 = vadd.f32 %v2801_v44, %v2833_v14  ;;  %v414_v17 = vadd.f32 %v2807_v51, %v2801_v44  ;;  %v438_v24 = vadd.f32 %v2801_v44, %v2851_v34  ;;  %v441_v51 = vadd.f32 %v2801_v44, %v2862_v50 }
  0xf9   :  { %v361_v22 = vadd.f32 %v2801_v44, %v360_v21  ;;  %v555_v23 = vmax.f32 %v369_v19, 0.0  ;;  %v2906_v21 = vpop.f32.mrf.mxu1  ;;  %v454_v34 = vadd.f32 %v2801_v44, %v2870_v6  ;;  %v457_v50 = vadd.f32 %v2801_v44, %v2878_v26 }
  0xfa   :  { %v2284_v25 = vpop.f32.mrf.mxu0  ;;  %v574_v6 = vmax.f32 %v446_v8, 0.0  ;;  %v494_v36 = vadd.f32 %v2906_v21, %v2801_v44 }
  0xfb   :  { %v553_v29 = vmax.f32 %v361_v22, 0.0  ;;  %v607_v33 = vpack.c.bf16 %v555_v23, %v554_v30  ;;  %v382_v39 = vadd.f32 %v2284_v25, %v2801_v44  ;;  %v568_v22 = vmax.f32 %v422_v13, 0.0  ;;  %v485_v14 = vpop.f32.mrf.mxu1 }
  0xfc   :  { %v373_v31 = vpop.f32.mrf.mxu0  ;;  %v569_v23 = vmax.f32 %v425_v15, 0.0  ;;  %v566_v25 = vmax.f32 %v414_v17, 0.0  ;;  %v486_v46 = vadd.f32 %v2801_v44, %v485_v14 }
  0xfd   :  { %v606_v32 = vpack.c.bf16 %v553_v29, %v552_v27  ;;  %v374_v37 = vadd.f32 %v2801_v44, %v373_v31  ;;  %v558_v49 = vmax.f32 %v382_v39, 0.0  ;;  %v567_v27 = vmax.f32 %v417_v20, 0.0 }
  0xfe   :  { %v2285_v35 = vpop.f32.mrf.mxu0  ;;  %v614_v29 = vpack.c.bf16 %v569_v23, %v568_v22  ;;  %v433_v31 = vadd.f32 %v2835_v18, %v2801_v44  ;;  %v449_v18 = vadd.f32 %v2856_v41, %v2801_v44  ;;  %v473_v41 = vadd.f32 %v2801_v44, %v472_v7 }
  0xff   :  { %v385_v38 = vadd.f32 %v2285_v35, %v2801_v44  ;;  %2358 = vmatprep.mubr.bf16.mxu1 %v606_v32  ;;  %v556_v47 = vmax.f32 %v374_v37, 0.0  ;;  %v613_v30 = vpack.c.bf16 %v567_v27, %v566_v25  ;;  %v2313_v32 = vpop.f32.mrf.mxu1  ;;  %v573_v35 = vmax.f32 %v441_v51, 0.0 }
 0x100   :  { %v376_v40 = vpop.f32.mrf.mxu0  ;;  %2359 = vmatmul.mubr.bf16.gmra.mxu1 %v607_v33  ;;  %v572_v33 = vmax.f32 %v438_v24, 0.0  ;;  %v570_v37 = vmax.f32 %v430_v62, 0.0  ;;  %v584_v7 = vmax.f32 %v486_v46, 0.0  ;;  %v586_v23 = vmax.f32 %v494_v36, 0.0 }
 0x101   :  { %v377_v42 = vadd.f32 %v2801_v44, %v376_v40  ;;  %v559_v43 = vmax.f32 %v385_v38, 0.0  ;;  %v571_v38 = vmax.f32 %v433_v31, 0.0  ;;  %v488_v39 = vpop.f32.mrf.mxu1 }
 0x102   :  { %v2288_v45 = vpop.f32.mrf.mxu0  ;;  %v616_v40 = vpack.c.bf16 %v573_v35, %v572_v33 }
 0x103   :  { %v557_v48 = vmax.f32 %v377_v42, 0.0  ;;  %v609_v56 = vpack.c.bf16 %v559_v43, %v558_v49  ;;  %v398_v0 = vadd.f32 %v2288_v45, %v2801_v44  ;;  %v615_v42 = vpack.c.bf16 %v571_v38, %v570_v37  ;;  %v2316_v43 = vpop.f32.mrf.mxu1  ;;  %v2503_v45 = vld [vmem:[%s3189_s5] sm:$0xff]  }
 0x104   :  { %v389_v52 = vpop.f32.mrf.mxu0  ;;  %v575_v49 = vmax.f32 %v449_v18, 0.0  ;;  %2416 = vmatprep.subr.bf16.mxu0 %v2503_v45  ;;  %v2954_v18 = vld [vmem:[%s3190_s4] ss:$0 sm:$0xff] }
 0x105   :  { %v608_v53 = vpack.c.bf16 %v557_v48, %v556_v47  ;;  %v390_v61 = vadd.f32 %v2801_v44, %v389_v52  ;;  %v562_v10 = vmax.f32 %v398_v0, 0.0  ;;  %v576_v47 = vmax.f32 %v454_v34, 0.0  ;;  %v501_v52 = vpop.f32.mrf.mxu1  ;;  %2417 = vmatpush3.bf16.msra.mxu0 %v2503_v45 }
 0x106   :  { %v2289_v57 = vpop.f32.mrf.mxu0  ;;  %v577_v48 = vmax.f32 %v457_v50, 0.0  ;;  %v579_v0 = vmax.f32 %v465_v55, 0.0  ;;  %v502_v13 = vadd.f32 %v2801_v44, %v501_v52 }
 0x107   :  { %v401_v63 = vadd.f32 %v2289_v57, %v2801_v44  ;;  %2362 = vmatprep.mubr.bf16.mxu1 %v608_v53  ;;  %v560_v4 = vmax.f32 %v390_v61, 0.0  ;;  %v617_v53 = vpack.c.bf16 %v575_v49, %v574_v6  ;;  %v580_v57 = vmax.f32 %v470_v28, 0.0 }
 0x108   :  { %v392_v1 = vpop.f32.mrf.mxu0  ;;  %2363 = vmatmul.mubr.bf16.gmra.mxu1 %v609_v56  ;;  %v618_v26 = vpack.c.bf16 %v577_v48, %v576_v47  ;;  %v2317_v56 = vpop.f32.mrf.mxu1  ;;  %v581_v61 = vmax.f32 %v473_v41, 0.0  ;;  %v588_v20 = vmax.f32 %v502_v13, 0.0 }
 0x109   :  { %v393_v3 = vadd.f32 %v2801_v44, %v392_v1  ;;  %v563_v5 = vmax.f32 %v401_v63, 0.0  ;;  %v578_v63 = vmax.f32 %v462_v54, 0.0  ;;  %v513_v21 = vadd.f32 %v2317_v56, %v2801_v44 }
 0x10a   :  { %v504_v1 = vpop.f32.mrf.mxu1  ;;  %v620_v2 = vpack.c.bf16 %v581_v61, %v580_v57 }
 0x10b   :  { %v561_v9 = vmax.f32 %v393_v3, 0.0  ;;  %v611_v19 = vpack.c.bf16 %v563_v5, %v562_v10  ;;  %v489_v3 = vadd.f32 %v2801_v44, %v488_v39  ;;  %v619_v58 = vpack.c.bf16 %v579_v0, %v578_v63 }
 0x10c   :  { %v2320_v5 = vpop.f32.mrf.mxu1  ;;  %v583_v10 = vmax.f32 %v481_v16, 0.0  ;;  %v505_v15 = vadd.f32 %v2801_v44, %v504_v1  ;;  %v591_v33 = vmax.f32 %v513_v21, 0.0 }
 0x10d   :  { %v610_v11 = vpack.c.bf16 %v561_v9, %v560_v4  ;;  %v585_v4 = vmax.f32 %v489_v3, 0.0  ;;  %v582_v9 = vmax.f32 %v478_v60, 0.0  ;;  %v526_v38 = vadd.f32 %v2320_v5, %v2801_v44 }
 0x10e   :  { %v589_v22 = vmax.f32 %v505_v15, 0.0 }
 0x10f   :  { %2366 = vmatprep.mubr.bf16.mxu1 %v610_v11  ;;  %v517_v11 = vpop.f32.mrf.mxu1  ;;  %v621_v17 = vpack.c.bf16 %v583_v10, %v582_v9 }
 0x110   :  { %2367 = vmatmul.mubr.bf16.gmra.mxu1 %v611_v19  ;;  %v497_v19 = vadd.f32 %v2313_v32, %v2801_v44  ;;  %v624_v14 = vpack.c.bf16 %v589_v22, %v588_v20 }
 0x111   :  { %2370 = vmatprep.mubr.bf16.mxu1 %v612_v12  ;;  %v622_v12 = vpack.c.bf16 %v585_v4, %v584_v7  ;;  %v2321_v59 = vpop.f32.mrf.mxu1 }
 0x112   :  { %v587_v25 = vmax.f32 %v497_v19, 0.0  ;;  %v529_v39 = vadd.f32 %v2321_v59, %v2801_v44 }
 0x113   :  { %v520_v27 = vpop.f32.mrf.mxu1 }
 0x114   :  { %v521_v24 = vadd.f32 %v2801_v44, %v520_v27  ;;  %v623_v51 = vpack.c.bf16 %v587_v25, %v586_v23  ;;  %v595_v34 = vmax.f32 %v529_v39, 0.0 }
 0x116   :  { %v593_v31 = vmax.f32 %v521_v24, 0.0 }
 0x118   :  { %2371 = vmatmul.mubr.bf16.gmra.mxu1 %v613_v30  ;;  %v510_v30 = vadd.f32 %v2316_v43, %v2801_v44 }
 0x119   :  { %2374 = vmatprep.mubr.bf16.mxu1 %v614_v29  ;;  %v518_v29 = vadd.f32 %v2801_v44, %v517_v11 }
 0x11a   :  { %v590_v32 = vmax.f32 %v510_v30, 0.0 }
 0x11b   :  { %v592_v62 = vmax.f32 %v518_v29, 0.0 }
 0x11c   :  { %v625_v37 = vpack.c.bf16 %v591_v33, %v590_v32 }
 0x11d   :  { %v626_v35 = vpack.c.bf16 %v593_v31, %v592_v62 }
 0x120   :  { %2375 = vmatmul.mubr.bf16.gmra.mxu1 %v615_v42 }
 0x121   :  { %2378 = vmatprep.mubr.bf16.mxu1 %v616_v40  ;;  %v594_v40 = vmax.f32 %v526_v38, 0.0 }
 0x123   :  { %v627_v50 = vpack.c.bf16 %v595_v34, %v594_v40 }
 0x128   :  { %2379 = vmatmul.mubr.bf16.gmra.mxu1 %v617_v53 }
 0x129   :  { %2382 = vmatprep.mubr.bf16.mxu1 %v618_v26 }
 0x130   :  { %2383 = vmatmul.mubr.bf16.gmra.mxu1 %v619_v58 }
 0x131   :  { %2386 = vmatprep.mubr.bf16.mxu1 %v620_v2 }
 0x138   :  { %2387 = vmatmul.mubr.bf16.gmra.mxu1 %v621_v17 }
 0x139   :  { %2390 = vmatprep.mubr.bf16.mxu1 %v622_v12 }
 0x140   :  { %2391 = vmatmul.mubr.bf16.gmra.mxu1 %v623_v51 }
 0x141   :  { %2394 = vmatprep.mubr.bf16.mxu1 %v624_v14 }
 0x148   :  { %2395 = vmatmul.mubr.bf16.gmra.mxu1 %v625_v37 }
 0x149   :  { %2398 = vmatprep.mubr.bf16.mxu1 %v626_v35 }
 0x150   :  { %2399 = vmatmul.mubr.bf16.gmra.mxu1 %v627_v50 }
 0x198   :  { %v2340_v42 = vpop.f32.mrf.mxu1 }
 0x199   :  { %v742_v44 = vadd.f32 %v2340_v42, %v2954_v18 }
 0x19a   :  { %v733_v8 = vpop.f32.mrf.mxu1 }
 0x19b   :  { %v734_v45 = vadd.f32 %v2954_v18, %v733_v8  ;;  %v990_v41 = vmax.f32 %v742_v44, 0.0 }
 0x19c   :  { %v2341_v43 = vpop.f32.mrf.mxu1 }
 0x19d   :  { %v745_v47 = vadd.f32 %v2341_v43, %v2954_v18  ;;  %v988_v26 = vmax.f32 %v734_v45, 0.0 }
 0x19e   :  { %v736_v48 = vpop.f32.mrf.mxu1 }
 0x19f   :  { %v737_v6 = vadd.f32 %v2954_v18, %v736_v48  ;;  %v991_v49 = vmax.f32 %v745_v47, 0.0 }
 0x1a0   :  { %v2344_v52 = vpop.f32.mrf.mxu1 }
 0x1a1   :  { %v989_v28 = vmax.f32 %v737_v6, 0.0  ;;  %v1053_v55 = vpack.c.bf16 %v991_v49, %v990_v41  ;;  %v758_v63 = vadd.f32 %v2344_v52, %v2954_v18 }
 0x1a2   :  { %v749_v53 = vpop.f32.mrf.mxu1 }
 0x1a3   :  { %v1052_v54 = vpack.c.bf16 %v989_v28, %v988_v26  ;;  %v750_v57 = vadd.f32 %v2954_v18, %v749_v53  ;;  %v994_v60 = vmax.f32 %v758_v63, 0.0 }
 0x1a4   :  { %v2345_v56 = vpop.f32.mrf.mxu1 }
 0x1a5   :  { %v761_v61 = vadd.f32 %v2345_v56, %v2954_v18  ;;  %2418 = vmatprep.mubr.bf16.mxu0 %v1052_v54  ;;  %v992_v3 = vmax.f32 %v750_v57, 0.0 }
 0x1a6   :  { %v752_v0 = vpop.f32.mrf.mxu1  ;;  %2419 = vmatmul.mubr.bf16.vlgmr.msra.gmra.mxu0 %v1053_v55 }
 0x1a7   :  { %v753_v1 = vadd.f32 %v2954_v18, %v752_v0  ;;  %v995_v2 = vmax.f32 %v761_v61, 0.0 }
 0x1a8   :  { %v2348_v46 = vpop.f32.mrf.mxu1 }
 0x1a9   :  { %v993_v58 = vmax.f32 %v753_v1, 0.0  ;;  %v1055_v7 = vpack.c.bf16 %v995_v2, %v994_v60  ;;  %v774_v11 = vadd.f32 %v2348_v46, %v2954_v18 }
 0x1aa   :  { %v765_v16 = vpop.f32.mrf.mxu1 }
 0x1ab   :  { %v1054_v5 = vpack.c.bf16 %v993_v58, %v992_v3  ;;  %v766_v9 = vadd.f32 %v2954_v18, %v765_v16  ;;  %v998_v59 = vmax.f32 %v774_v11, 0.0 }
 0x1ac   :  { %v2349_v4 = vpop.f32.mrf.mxu1 }
 0x1ad   :  { %v777_v10 = vadd.f32 %v2349_v4, %v2954_v18  ;;  %2422 = vmatprep.mubr.bf16.mxu0 %v1054_v5  ;;  %v996_v36 = vmax.f32 %v766_v9, 0.0 }
 0x1ae   :  { %v768_v12 = vpop.f32.mrf.mxu1  ;;  %2423 = vmatmul.mubr.bf16.gmra.mxu0 %v1055_v7 }
 0x1af   :  { %v769_v13 = vadd.f32 %v2954_v18, %v768_v12  ;;  %v999_v15 = vmax.f32 %v777_v10, 0.0 }
 0x1b0   :  { %v2352_v17 = vpop.f32.mrf.mxu1 }
 0x1b1   :  { %v997_v19 = vmax.f32 %v769_v13, 0.0  ;;  %v1057_v23 = vpack.c.bf16 %v999_v15, %v998_v59  ;;  %v790_v29 = vadd.f32 %v2352_v17, %v2954_v18 }
 0x1b2   :  { %v781_v20 = vpop.f32.mrf.mxu1 }
 0x1b3   :  { %v1056_v22 = vpack.c.bf16 %v997_v19, %v996_v36  ;;  %v782_v27 = vadd.f32 %v2954_v18, %v781_v20  ;;  %v1002_v32 = vmax.f32 %v790_v29, 0.0 }
 0x1b4   :  { %v2353_v25 = vpop.f32.mrf.mxu1 }
 0x1b5   :  { %v793_v14 = vadd.f32 %v2353_v25, %v2954_v18  ;;  %2426 = vmatprep.mubr.bf16.mxu0 %v1056_v22  ;;  %v1000_v62 = vmax.f32 %v782_v27, 0.0 }
 0x1b6   :  { %v784_v24 = vpop.f32.mrf.mxu1  ;;  %2427 = vmatmul.mubr.bf16.gmra.mxu0 %v1057_v23 }
 0x1b7   :  { %v785_v51 = vadd.f32 %v2954_v18, %v784_v24  ;;  %v1003_v30 = vmax.f32 %v793_v14, 0.0 }
 0x1b8   :  { %v2356_v21 = vpop.f32.mrf.mxu1 }
 0x1b9   :  { %v1001_v31 = vmax.f32 %v785_v51, 0.0  ;;  %v1059_v37 = vpack.c.bf16 %v1003_v30, %v1002_v32  ;;  %v806_v34 = vadd.f32 %v2356_v21, %v2954_v18 }
 0x1ba   :  { %v797_v33 = vpop.f32.mrf.mxu1 }
 0x1bb   :  { %v1058_v35 = vpack.c.bf16 %v1001_v31, %v1000_v62  ;;  %v798_v39 = vadd.f32 %v2954_v18, %v797_v33  ;;  %v1006_v44 = vmax.f32 %v806_v34, 0.0 }
 0x1bc   :  { %v2357_v38 = vpop.f32.mrf.mxu1 }
 0x1bd   :  { %v809_v40 = vadd.f32 %v2357_v38, %v2954_v18  ;;  %2430 = vmatprep.mubr.bf16.mxu0 %v1058_v35  ;;  %v1004_v45 = vmax.f32 %v798_v39, 0.0 }
 0x1be   :  { %v800_v50 = vpop.f32.mrf.mxu1  ;;  %2431 = vmatmul.mubr.bf16.gmra.mxu0 %v1059_v37 }
 0x1bf   :  { %v801_v42 = vadd.f32 %v2954_v18, %v800_v50  ;;  %v1007_v8 = vmax.f32 %v809_v40, 0.0 }
 0x1c0   :  { %v2360_v43 = vpop.f32.mrf.mxu1 }
 0x1c1   :  { %v1005_v47 = vmax.f32 %v801_v42, 0.0  ;;  %v1061_v49 = vpack.c.bf16 %v1007_v8, %v1006_v44  ;;  %v822_v41 = vadd.f32 %v2360_v43, %v2954_v18 }
 0x1c2   :  { %v813_v48 = vpop.f32.mrf.mxu1 }
 0x1c3   :  { %v1060_v6 = vpack.c.bf16 %v1005_v47, %v1004_v45  ;;  %v814_v26 = vadd.f32 %v2954_v18, %v813_v48  ;;  %v1010_v63 = vmax.f32 %v822_v41, 0.0 }
 0x1c4   :  { %v2361_v52 = vpop.f32.mrf.mxu1 }
 0x1c5   :  { %v825_v28 = vadd.f32 %v2361_v52, %v2954_v18  ;;  %2434 = vmatprep.mubr.bf16.mxu0 %v1060_v6  ;;  %v1008_v57 = vmax.f32 %v814_v26, 0.0 }
 0x1c6   :  { %v816_v53 = vpop.f32.mrf.mxu1  ;;  %2435 = vmatmul.mubr.bf16.gmra.mxu0 %v1061_v49 }
 0x1c7   :  { %v817_v54 = vadd.f32 %v2954_v18, %v816_v53  ;;  %v1011_v55 = vmax.f32 %v825_v28, 0.0 }
 0x1c8   :  { %v2364_v56 = vpop.f32.mrf.mxu1 }
 0x1c9   :  { %v1009_v61 = vmax.f32 %v817_v54, 0.0  ;;  %v1063_v2 = vpack.c.bf16 %v1011_v55, %v1010_v63  ;;  %v838_v60 = vadd.f32 %v2364_v56, %v2954_v18 }
 0x1ca   :  { %v829_v0 = vpop.f32.mrf.mxu1 }
 0x1cb   :  { %v1062_v1 = vpack.c.bf16 %v1009_v61, %v1008_v57  ;;  %v830_v3 = vadd.f32 %v2954_v18, %v829_v0  ;;  %v1014_v11 = vmax.f32 %v838_v60, 0.0 }
 0x1cc   :  { %v2365_v46 = vpop.f32.mrf.mxu1 }
 0x1cd   :  { %v841_v58 = vadd.f32 %v2365_v46, %v2954_v18  ;;  %2438 = vmatprep.mubr.bf16.mxu0 %v1062_v1  ;;  %v1012_v9 = vmax.f32 %v830_v3, 0.0 }
 0x1ce   :  { %v832_v16 = vpop.f32.mrf.mxu1  ;;  %2439 = vmatmul.mubr.bf16.gmra.mxu0 %v1063_v2 }
 0x1cf   :  { %v833_v5 = vadd.f32 %v2954_v18, %v832_v16  ;;  %v1015_v7 = vmax.f32 %v841_v58, 0.0 }
 0x1d0   :  { %v2368_v4 = vpop.f32.mrf.mxu1 }
 0x1d1   :  { %v1013_v10 = vmax.f32 %v833_v5, 0.0  ;;  %v1065_v15 = vpack.c.bf16 %v1015_v7, %v1014_v11  ;;  %v854_v59 = vadd.f32 %v2368_v4, %v2954_v18 }
 0x1d2   :  { %v845_v12 = vpop.f32.mrf.mxu1 }
 0x1d3   :  { %v1064_v13 = vpack.c.bf16 %v1013_v10, %v1012_v9  ;;  %v846_v36 = vadd.f32 %v2954_v18, %v845_v12  ;;  %v1018_v29 = vmax.f32 %v854_v59, 0.0 }
 0x1d4   :  { %v2369_v17 = vpop.f32.mrf.mxu1 }
 0x1d5   :  { %v857_v19 = vadd.f32 %v2369_v17, %v2954_v18  ;;  %2442 = vmatprep.mubr.bf16.mxu0 %v1064_v13  ;;  %v1016_v27 = vmax.f32 %v846_v36, 0.0 }
 0x1d6   :  { %v848_v20 = vpop.f32.mrf.mxu1  ;;  %2443 = vmatmul.mubr.bf16.gmra.mxu0 %v1065_v15 }
 0x1d7   :  { %v849_v22 = vadd.f32 %v2954_v18, %v848_v20  ;;  %v1019_v23 = vmax.f32 %v857_v19, 0.0 }
 0x1d8   :  { %v2372_v25 = vpop.f32.mrf.mxu1 }
 0x1d9   :  { %v1017_v14 = vmax.f32 %v849_v22, 0.0  ;;  %v1067_v30 = vpack.c.bf16 %v1019_v23, %v1018_v29  ;;  %v870_v32 = vadd.f32 %v2372_v25, %v2954_v18 }
 0x1da   :  { %v861_v24 = vpop.f32.mrf.mxu1 }
 0x1db   :  { %v1066_v51 = vpack.c.bf16 %v1017_v14, %v1016_v27  ;;  %v862_v62 = vadd.f32 %v2954_v18, %v861_v24  ;;  %v1022_v34 = vmax.f32 %v870_v32, 0.0 }
 0x1dc   :  { %v2373_v21 = vpop.f32.mrf.mxu1 }
 0x1dd   :  { %v873_v31 = vadd.f32 %v2373_v21, %v2954_v18  ;;  %2446 = vmatprep.mubr.bf16.mxu0 %v1066_v51  ;;  %v1020_v39 = vmax.f32 %v862_v62, 0.0 }
 0x1de   :  { %v864_v33 = vpop.f32.mrf.mxu1  ;;  %2447 = vmatmul.mubr.bf16.gmra.mxu0 %v1067_v30 }
 0x1df   :  { %v865_v35 = vadd.f32 %v2954_v18, %v864_v33  ;;  %v1023_v37 = vmax.f32 %v873_v31, 0.0 }
 0x1e0   :  { %v2376_v38 = vpop.f32.mrf.mxu1 }
 0x1e1   :  { %v1021_v40 = vmax.f32 %v865_v35, 0.0  ;;  %v1069_v8 = vpack.c.bf16 %v1023_v37, %v1022_v34  ;;  %v886_v44 = vadd.f32 %v2376_v38, %v2954_v18 }
 0x1e2   :  { %v877_v50 = vpop.f32.mrf.mxu1 }
 0x1e3   :  { %v1068_v42 = vpack.c.bf16 %v1021_v40, %v1020_v39  ;;  %v878_v45 = vadd.f32 %v2954_v18, %v877_v50  ;;  %v1026_v41 = vmax.f32 %v886_v44, 0.0 }
 0x1e4   :  { %v2377_v43 = vpop.f32.mrf.mxu1 }
 0x1e5   :  { %v889_v47 = vadd.f32 %v2377_v43, %v2954_v18  ;;  %2450 = vmatprep.mubr.bf16.mxu0 %v1068_v42  ;;  %v1024_v26 = vmax.f32 %v878_v45, 0.0 }
 0x1e6   :  { %v880_v48 = vpop.f32.mrf.mxu1  ;;  %2451 = vmatmul.mubr.bf16.gmra.mxu0 %v1069_v8 }
 0x1e7   :  { %v881_v6 = vadd.f32 %v2954_v18, %v880_v48  ;;  %v1027_v49 = vmax.f32 %v889_v47, 0.0 }
 0x1e8   :  { %v2380_v52 = vpop.f32.mrf.mxu1 }
 0x1e9   :  { %v1025_v28 = vmax.f32 %v881_v6, 0.0  ;;  %v1071_v55 = vpack.c.bf16 %v1027_v49, %v1026_v41  ;;  %v902_v63 = vadd.f32 %v2380_v52, %v2954_v18 }
 0x1ea   :  { %v893_v53 = vpop.f32.mrf.mxu1 }
 0x1eb   :  { %v1070_v54 = vpack.c.bf16 %v1025_v28, %v1024_v26  ;;  %v894_v57 = vadd.f32 %v2954_v18, %v893_v53  ;;  %v1030_v60 = vmax.f32 %v902_v63, 0.0 }
 0x1ec   :  { %v2381_v56 = vpop.f32.mrf.mxu1 }
 0x1ed   :  { %v905_v61 = vadd.f32 %v2381_v56, %v2954_v18  ;;  %2454 = vmatprep.mubr.bf16.mxu0 %v1070_v54  ;;  %v1028_v3 = vmax.f32 %v894_v57, 0.0 }
 0x1ee   :  { %v896_v0 = vpop.f32.mrf.mxu1  ;;  %2455 = vmatmul.mubr.bf16.gmra.mxu0 %v1071_v55 }
 0x1ef   :  { %v897_v1 = vadd.f32 %v2954_v18, %v896_v0  ;;  %v1031_v2 = vmax.f32 %v905_v61, 0.0 }
 0x1f0   :  { %v2384_v46 = vpop.f32.mrf.mxu1 }
 0x1f1   :  { %v1029_v58 = vmax.f32 %v897_v1, 0.0  ;;  %v1073_v7 = vpack.c.bf16 %v1031_v2, %v1030_v60  ;;  %v918_v11 = vadd.f32 %v2384_v46, %v2954_v18 }
 0x1f2   :  { %v909_v16 = vpop.f32.mrf.mxu1 }
 0x1f3   :  { %v1072_v5 = vpack.c.bf16 %v1029_v58, %v1028_v3  ;;  %v910_v9 = vadd.f32 %v2954_v18, %v909_v16  ;;  %v1034_v59 = vmax.f32 %v918_v11, 0.0 }
 0x1f4   :  { %v2385_v4 = vpop.f32.mrf.mxu1 }
 0x1f5   :  { %v921_v10 = vadd.f32 %v2385_v4, %v2954_v18  ;;  %2458 = vmatprep.mubr.bf16.mxu0 %v1072_v5  ;;  %v1032_v36 = vmax.f32 %v910_v9, 0.0 }
 0x1f6   :  { %v912_v12 = vpop.f32.mrf.mxu1  ;;  %2459 = vmatmul.mubr.bf16.gmra.mxu0 %v1073_v7 }
 0x1f7   :  { %v913_v13 = vadd.f32 %v2954_v18, %v912_v12  ;;  %v1035_v15 = vmax.f32 %v921_v10, 0.0 }
 0x1f8   :  { %v2388_v17 = vpop.f32.mrf.mxu1 }
 0x1f9   :  { %v1033_v19 = vmax.f32 %v913_v13, 0.0  ;;  %v1075_v23 = vpack.c.bf16 %v1035_v15, %v1034_v59  ;;  %v934_v29 = vadd.f32 %v2388_v17, %v2954_v18  ;;  %v3023_v15 = vld [vmem:[%s3191_s6] ss:$0 sm:$0xff] }
 0x1fa   :  { %v925_v20 = vpop.f32.mrf.mxu1 }
 0x1fb   :  { %v1074_v22 = vpack.c.bf16 %v1033_v19, %v1032_v36  ;;  %v926_v27 = vadd.f32 %v2954_v18, %v925_v20  ;;  %v1038_v32 = vmax.f32 %v934_v29, 0.0 }
 0x1fc   :  { %v2389_v25 = vpop.f32.mrf.mxu1 }
 0x1fd   :  { %v937_v14 = vadd.f32 %v2389_v25, %v2954_v18  ;;  %2462 = vmatprep.mubr.bf16.mxu0 %v1074_v22  ;;  %v1036_v62 = vmax.f32 %v926_v27, 0.0 }
 0x1fe   :  { %v928_v24 = vpop.f32.mrf.mxu1  ;;  %2463 = vmatmul.mubr.bf16.gmra.mxu0 %v1075_v23 }
 0x1ff   :  { %v929_v51 = vadd.f32 %v2954_v18, %v928_v24  ;;  %v1039_v30 = vmax.f32 %v937_v14, 0.0 }
 0x200   :  { %v2392_v21 = vpop.f32.mrf.mxu1 }
 0x201   :  { %v1037_v31 = vmax.f32 %v929_v51, 0.0  ;;  %v1077_v37 = vpack.c.bf16 %v1039_v30, %v1038_v32  ;;  %v950_v34 = vadd.f32 %v2392_v21, %v2954_v18 }
 0x202   :  { %v941_v33 = vpop.f32.mrf.mxu1 }
 0x203   :  { %v1076_v35 = vpack.c.bf16 %v1037_v31, %v1036_v62  ;;  %v942_v39 = vadd.f32 %v2954_v18, %v941_v33  ;;  %v1042_v44 = vmax.f32 %v950_v34, 0.0 }
 0x204   :  { %v2393_v38 = vpop.f32.mrf.mxu1 }
 0x205   :  { %v953_v40 = vadd.f32 %v2393_v38, %v2954_v18  ;;  %2466 = vmatprep.mubr.bf16.mxu0 %v1076_v35  ;;  %v1040_v45 = vmax.f32 %v942_v39, 0.0 }
 0x206   :  { %v944_v50 = vpop.f32.mrf.mxu1  ;;  %2467 = vmatmul.mubr.bf16.gmra.mxu0 %v1077_v37 }
 0x207   :  { %v945_v42 = vadd.f32 %v2954_v18, %v944_v50  ;;  %v1043_v8 = vmax.f32 %v953_v40, 0.0 }
 0x208   :  { %v2396_v43 = vpop.f32.mrf.mxu1 }
 0x209   :  { %v1041_v47 = vmax.f32 %v945_v42, 0.0  ;;  %v1079_v49 = vpack.c.bf16 %v1043_v8, %v1042_v44  ;;  %v966_v41 = vadd.f32 %v2396_v43, %v2954_v18 }
 0x20a   :  { %v957_v48 = vpop.f32.mrf.mxu1 }
 0x20b   :  { %v1078_v6 = vpack.c.bf16 %v1041_v47, %v1040_v45  ;;  %v958_v26 = vadd.f32 %v2954_v18, %v957_v48  ;;  %v1046_v63 = vmax.f32 %v966_v41, 0.0 }
 0x20c   :  { %v2397_v52 = vpop.f32.mrf.mxu1 }
 0x20d   :  { %v969_v28 = vadd.f32 %v2397_v52, %v2954_v18  ;;  %2470 = vmatprep.mubr.bf16.mxu0 %v1078_v6  ;;  %v1044_v57 = vmax.f32 %v958_v26, 0.0 }
 0x20e   :  { %v960_v53 = vpop.f32.mrf.mxu1  ;;  %2471 = vmatmul.mubr.bf16.gmra.mxu0 %v1079_v49 }
 0x20f   :  { %v961_v54 = vadd.f32 %v2954_v18, %v960_v53  ;;  %v1047_v55 = vmax.f32 %v969_v28, 0.0 }
 0x210   :  { %v2400_v56 = vpop.f32.mrf.mxu1 }
 0x211   :  { %v1045_v61 = vmax.f32 %v961_v54, 0.0  ;;  %v1081_v2 = vpack.c.bf16 %v1047_v55, %v1046_v63  ;;  %v982_v60 = vadd.f32 %v2400_v56, %v2954_v18 }
 0x212   :  { %v973_v0 = vpop.f32.mrf.mxu1 }
 0x213   :  { %v1080_v1 = vpack.c.bf16 %v1045_v61, %v1044_v57  ;;  %v974_v3 = vadd.f32 %v2954_v18, %v973_v0  ;;  %v1050_v10 = vmax.f32 %v982_v60, 0.0 }
 0x214   :  { %v2401_v46 = vpop.f32.mrf.mxu1 }
 0x215   :  { %v985_v58 = vadd.f32 %v2401_v46, %v2954_v18  ;;  %2474 = vmatprep.mubr.bf16.mxu0 %v1080_v1  ;;  %v1048_v4 = vmax.f32 %v974_v3, 0.0 }
 0x216   :  { %v976_v16 = vpop.f32.mrf.mxu1  ;;  %2475 = vmatmul.mubr.bf16.gmra.mxu0 %v1081_v2 }
 0x217   :  { %v977_v5 = vadd.f32 %v2954_v18, %v976_v16  ;;  %v1051_v7 = vmax.f32 %v985_v58, 0.0 }
 0x219   :  { %v1049_v9 = vmax.f32 %v977_v5, 0.0  ;;  %v1083_v12 = vpack.c.bf16 %v1051_v7, %v1050_v10 }
 0x21b   :  { %v1082_v11 = vpack.c.bf16 %v1049_v9, %v1048_v4 }
 0x21d   :  { %2478 = vmatprep.mubr.bf16.mxu0 %v1082_v11 }
 0x21e   :  { %2479 = vmatmul.mubr.bf16.gmra.mxu0 %v1083_v12 }
 0x266   :  { %v2420_v13 = vpop.f32.mrf.mxu0 }
 0x267   :  { %v1198_v19 = vadd.f32 %v2420_v13, %v3023_v15 }
 0x268   :  { %v1189_v17 = vpop.f32.mrf.mxu0 }
 0x269   :  { %v1190_v20 = vadd.f32 %v3023_v15, %v1189_v17 }
 0x26a   :  { %v2421_v36 = vpop.f32.mrf.mxu0 }
 0x26b   :  { %v1201_v18 = vadd.f32 %v2421_v36, %v3023_v15 }
 0x26c   :  { %v1192_v59 = vpop.f32.mrf.mxu0 }
 0x26d   :  { %v1957_v22 = vpack.c.bf16 %v1201_v18, %v1198_v19  ;;  %v1193_v23 = vadd.f32 %v3023_v15, %v1192_v59 }
 0x26e   :  { %v2424_v25 = vpop.f32.mrf.mxu0 }
 0x26f   :  { %2109 = vst [vmem:[%s3192_s7 + $0x8] sm:$0xff] %v1957_v22   ;;  %v1952_v27 = vpack.c.bf16 %v1193_v23, %v1190_v20  ;;  %v1214_v24 = vadd.f32 %v2424_v25, %v3023_v15 }
 0x270   :  { %v1205_v14 = vpop.f32.mrf.mxu0 }
 0x271   :  { %1953 = vst [vmem:[%s3192_s7] sm:$0xff] %v1952_v27   ;;  %v1206_v21 = vadd.f32 %v3023_v15, %v1205_v14 }
 0x272   :  { %v2425_v29 = vpop.f32.mrf.mxu0 }
 0x273   :  { %v1217_v51 = vadd.f32 %v2425_v29, %v3023_v15 }
 0x274   :  { %v1208_v30 = vpop.f32.mrf.mxu0 }
 0x275   :  { %v1967_v62 = vpack.c.bf16 %v1217_v51, %v1214_v24  ;;  %v1209_v31 = vadd.f32 %v3023_v15, %v1208_v30 }
 0x276   :  { %v2428_v32 = vpop.f32.mrf.mxu0 }
 0x277   :  { %2111 = vst [vmem:[%s3192_s7 + $0x18] sm:$0xff] %v1967_v62   ;;  %v1962_v33 = vpack.c.bf16 %v1209_v31, %v1206_v21  ;;  %v1230_v38 = vadd.f32 %v2428_v32, %v3023_v15 }
 0x278   :  { %v1221_v35 = vpop.f32.mrf.mxu0 }
 0x279   :  { %2110 = vst [vmem:[%s3192_s7 + $0x10] sm:$0xff] %v1962_v33   ;;  %v1222_v34 = vadd.f32 %v3023_v15, %v1221_v35 }
 0x27a   :  { %v2429_v37 = vpop.f32.mrf.mxu0 }
 0x27b   :  { %v1233_v39 = vadd.f32 %v2429_v37, %v3023_v15 }
 0x27c   :  { %v1224_v40 = vpop.f32.mrf.mxu0 }
 0x27d   :  { %v1977_v50 = vpack.c.bf16 %v1233_v39, %v1230_v38  ;;  %v1225_v42 = vadd.f32 %v3023_v15, %v1224_v40 }
 0x27e   :  { %v2432_v8 = vpop.f32.mrf.mxu0 }
 0x27f   :  { %2113 = vst [vmem:[%s3192_s7 + $0x28] sm:$0xff] %v1977_v50   ;;  %v1972_v43 = vpack.c.bf16 %v1225_v42, %v1222_v34  ;;  %v1246_v44 = vadd.f32 %v2432_v8, %v3023_v15 }
 0x280   :  { %v1237_v45 = vpop.f32.mrf.mxu0 }
 0x281   :  { %2112 = vst [vmem:[%s3192_s7 + $0x20] sm:$0xff] %v1972_v43   ;;  %v1238_v49 = vadd.f32 %v3023_v15, %v1237_v45 }
 0x282   :  { %v2433_v47 = vpop.f32.mrf.mxu0 }
 0x283   :  { %v1249_v48 = vadd.f32 %v2433_v47, %v3023_v15 }
 0x284   :  { %v1240_v6 = vpop.f32.mrf.mxu0 }
 0x285   :  { %v1987_v52 = vpack.c.bf16 %v1249_v48, %v1246_v44  ;;  %v1241_v26 = vadd.f32 %v3023_v15, %v1240_v6 }
 0x286   :  { %v2436_v28 = vpop.f32.mrf.mxu0 }
 0x287   :  { %2115 = vst [vmem:[%s3192_s7 + $0x38] sm:$0xff] %v1987_v52   ;;  %v1982_v41 = vpack.c.bf16 %v1241_v26, %v1238_v49  ;;  %v1262_v55 = vadd.f32 %v2436_v28, %v3023_v15 }
 0x288   :  { %v1253_v53 = vpop.f32.mrf.mxu0 }
 0x289   :  { %2114 = vst [vmem:[%s3192_s7 + $0x30] sm:$0xff] %v1982_v41   ;;  %v1254_v61 = vadd.f32 %v3023_v15, %v1253_v53 }
 0x28a   :  { %v2437_v54 = vpop.f32.mrf.mxu0 }
 0x28b   :  { %v1265_v56 = vadd.f32 %v2437_v54, %v3023_v15 }
 0x28c   :  { %v1256_v57 = vpop.f32.mrf.mxu0 }
 0x28d   :  { %v1997_v63 = vpack.c.bf16 %v1265_v56, %v1262_v55  ;;  %v1257_v0 = vadd.f32 %v3023_v15, %v1256_v57 }
 0x28e   :  { %v2440_v1 = vpop.f32.mrf.mxu0 }
 0x28f   :  { %2117 = vst [vmem:[%s3192_s7 + $0x48] sm:$0xff] %v1997_v63   ;;  %v1992_v2 = vpack.c.bf16 %v1257_v0, %v1254_v61  ;;  %v1278_v58 = vadd.f32 %v2440_v1, %v3023_v15 }
 0x290   :  { %v1269_v46 = vpop.f32.mrf.mxu0 }
 0x291   :  { %2116 = vst [vmem:[%s3192_s7 + $0x40] sm:$0xff] %v1992_v2   ;;  %v1270_v5 = vadd.f32 %v3023_v15, %v1269_v46 }
 0x292   :  { %v2441_v3 = vpop.f32.mrf.mxu0 }
 0x293   :  { %v1281_v60 = vadd.f32 %v2441_v3, %v3023_v15 }
 0x294   :  { %v1272_v16 = vpop.f32.mrf.mxu0 }
 0x295   :  { %v2007_v7 = vpack.c.bf16 %v1281_v60, %v1278_v58  ;;  %v1273_v4 = vadd.f32 %v3023_v15, %v1272_v16 }
 0x296   :  { %v2444_v9 = vpop.f32.mrf.mxu0 }
 0x297   :  { %2119 = vst [vmem:[%s3192_s7 + $0x58] sm:$0xff] %v2007_v7   ;;  %v2002_v10 = vpack.c.bf16 %v1273_v4, %v1270_v5  ;;  %v1294_v13 = vadd.f32 %v2444_v9, %v3023_v15 }
 0x298   :  { %v1285_v11 = vpop.f32.mrf.mxu0 }
 0x299   :  { %2118 = vst [vmem:[%s3192_s7 + $0x50] sm:$0xff] %v2002_v10   ;;  %v1286_v19 = vadd.f32 %v3023_v15, %v1285_v11 }
 0x29a   :  { %v2445_v12 = vpop.f32.mrf.mxu0 }
 0x29b   :  { %v1297_v17 = vadd.f32 %v2445_v12, %v3023_v15 }
 0x29c   :  { %v1288_v36 = vpop.f32.mrf.mxu0 }
 0x29d   :  { %v2017_v18 = vpack.c.bf16 %v1297_v17, %v1294_v13  ;;  %v1289_v59 = vadd.f32 %v3023_v15, %v1288_v36 }
 0x29e   :  { %v2448_v20 = vpop.f32.mrf.mxu0 }
 0x29f   :  { %2121 = vst [vmem:[%s3192_s7 + $0x68] sm:$0xff] %v2017_v18   ;;  %v2012_v22 = vpack.c.bf16 %v1289_v59, %v1286_v19  ;;  %v1310_v27 = vadd.f32 %v2448_v20, %v3023_v15 }
 0x2a0   :  { %v1301_v23 = vpop.f32.mrf.mxu0 }
 0x2a1   :  { %2120 = vst [vmem:[%s3192_s7 + $0x60] sm:$0xff] %v2012_v22   ;;  %v1302_v24 = vadd.f32 %v3023_v15, %v1301_v23 }
 0x2a2   :  { %v2449_v25 = vpop.f32.mrf.mxu0 }
 0x2a3   :  { %v1313_v14 = vadd.f32 %v2449_v25, %v3023_v15 }
 0x2a4   :  { %v1304_v29 = vpop.f32.mrf.mxu0 }
 0x2a5   :  { %v2027_v51 = vpack.c.bf16 %v1313_v14, %v1310_v27  ;;  %v1305_v30 = vadd.f32 %v3023_v15, %v1304_v29 }
 0x2a6   :  { %v2452_v21 = vpop.f32.mrf.mxu0 }
 0x2a7   :  { %2123 = vst [vmem:[%s3192_s7 + $0x78] sm:$0xff] %v2027_v51   ;;  %v2022_v62 = vpack.c.bf16 %v1305_v30, %v1302_v24  ;;  %v1326_v33 = vadd.f32 %v2452_v21, %v3023_v15 }
 0x2a8   :  { %v1317_v31 = vpop.f32.mrf.mxu0 }
 0x2a9   :  { %2122 = vst [vmem:[%s3192_s7 + $0x70] sm:$0xff] %v2022_v62   ;;  %v1318_v38 = vadd.f32 %v3023_v15, %v1317_v31 }
 0x2aa   :  { %v2453_v32 = vpop.f32.mrf.mxu0 }
 0x2ab   :  { %v1329_v35 = vadd.f32 %v2453_v32, %v3023_v15 }
 0x2ac   :  { %v1320_v37 = vpop.f32.mrf.mxu0 }
 0x2ad   :  { %v2037_v39 = vpack.c.bf16 %v1329_v35, %v1326_v33  ;;  %v1321_v40 = vadd.f32 %v3023_v15, %v1320_v37 }
 0x2ae   :  { %v2456_v34 = vpop.f32.mrf.mxu0 }
 0x2af   :  { %2125 = vst [vmem:[%s3192_s7 + $0x88] sm:$0xff] %v2037_v39   ;;  %v2032_v50 = vpack.c.bf16 %v1321_v40, %v1318_v38  ;;  %v1342_v43 = vadd.f32 %v2456_v34, %v3023_v15 }
 0x2b0   :  { %v1333_v42 = vpop.f32.mrf.mxu0 }
 0x2b1   :  { %2124 = vst [vmem:[%s3192_s7 + $0x80] sm:$0xff] %v2032_v50   ;;  %v1334_v44 = vadd.f32 %v3023_v15, %v1333_v42 }
 0x2b2   :  { %v2457_v8 = vpop.f32.mrf.mxu0 }
 0x2b3   :  { %v1345_v45 = vadd.f32 %v2457_v8, %v3023_v15 }
 0x2b4   :  { %v1336_v47 = vpop.f32.mrf.mxu0 }
 0x2b5   :  { %v2047_v48 = vpack.c.bf16 %v1345_v45, %v1342_v43  ;;  %v1337_v6 = vadd.f32 %v3023_v15, %v1336_v47 }
 0x2b6   :  { %v2460_v49 = vpop.f32.mrf.mxu0 }
 0x2b7   :  { %2127 = vst [vmem:[%s3192_s7 + $0x98] sm:$0xff] %v2047_v48   ;;  %v2042_v52 = vpack.c.bf16 %v1337_v6, %v1334_v44  ;;  %v1358_v41 = vadd.f32 %v2460_v49, %v3023_v15 }
 0x2b8   :  { %v1349_v26 = vpop.f32.mrf.mxu0 }
 0x2b9   :  { %2126 = vst [vmem:[%s3192_s7 + $0x90] sm:$0xff] %v2042_v52   ;;  %v1350_v55 = vadd.f32 %v3023_v15, %v1349_v26 }
 0x2ba   :  { %v2461_v28 = vpop.f32.mrf.mxu0 }
 0x2bb   :  { %v1361_v53 = vadd.f32 %v2461_v28, %v3023_v15 }
 0x2bc   :  { %v1352_v54 = vpop.f32.mrf.mxu0 }
 0x2bd   :  { %v2057_v56 = vpack.c.bf16 %v1361_v53, %v1358_v41  ;;  %v1353_v57 = vadd.f32 %v3023_v15, %v1352_v54 }
 0x2be   :  { %v2464_v61 = vpop.f32.mrf.mxu0 }
 0x2bf   :  { %2129 = vst [vmem:[%s3192_s7 + $0xa8] sm:$0xff] %v2057_v56   ;;  %v2052_v63 = vpack.c.bf16 %v1353_v57, %v1350_v55  ;;  %v1374_v2 = vadd.f32 %v2464_v61, %v3023_v15 }
 0x2c0   :  { %v1365_v0 = vpop.f32.mrf.mxu0 }
 0x2c1   :  { %2128 = vst [vmem:[%s3192_s7 + $0xa0] sm:$0xff] %v2052_v63   ;;  %v1366_v58 = vadd.f32 %v3023_v15, %v1365_v0 }
 0x2c2   :  { %v2465_v1 = vpop.f32.mrf.mxu0 }
 0x2c3   :  { %v1377_v46 = vadd.f32 %v2465_v1, %v3023_v15 }
 0x2c4   :  { %v1368_v3 = vpop.f32.mrf.mxu0 }
 0x2c5   :  { %v2067_v60 = vpack.c.bf16 %v1377_v46, %v1374_v2  ;;  %v1369_v16 = vadd.f32 %v3023_v15, %v1368_v3 }
 0x2c6   :  { %v2468_v5 = vpop.f32.mrf.mxu0 }
 0x2c7   :  { %2131 = vst [vmem:[%s3192_s7 + $0xb8] sm:$0xff] %v2067_v60   ;;  %v2062_v7 = vpack.c.bf16 %v1369_v16, %v1366_v58  ;;  %v1390_v10 = vadd.f32 %v2468_v5, %v3023_v15 }
 0x2c8   :  { %v1381_v4 = vpop.f32.mrf.mxu0 }
 0x2c9   :  { %2130 = vst [vmem:[%s3192_s7 + $0xb0] sm:$0xff] %v2062_v7   ;;  %v1382_v13 = vadd.f32 %v3023_v15, %v1381_v4 }
 0x2ca   :  { %v2469_v9 = vpop.f32.mrf.mxu0 }
 0x2cb   :  { %v1393_v11 = vadd.f32 %v2469_v9, %v3023_v15 }
 0x2cc   :  { %v1384_v12 = vpop.f32.mrf.mxu0 }
 0x2cd   :  { %v2077_v17 = vpack.c.bf16 %v1393_v11, %v1390_v10  ;;  %v1385_v36 = vadd.f32 %v3023_v15, %v1384_v12 }
 0x2ce   :  { %v2472_v19 = vpop.f32.mrf.mxu0 }
 0x2cf   :  { %2133 = vst [vmem:[%s3192_s7 + $0xc8] sm:$0xff] %v2077_v17   ;;  %v2072_v18 = vpack.c.bf16 %v1385_v36, %v1382_v13  ;;  %v1406_v22 = vadd.f32 %v2472_v19, %v3023_v15 }
 0x2d0   :  { %v1397_v59 = vpop.f32.mrf.mxu0 }
 0x2d1   :  { %2132 = vst [vmem:[%s3192_s7 + $0xc0] sm:$0xff] %v2072_v18   ;;  %v1398_v27 = vadd.f32 %v3023_v15, %v1397_v59 }
 0x2d2   :  { %v2473_v20 = vpop.f32.mrf.mxu0 }
 0x2d3   :  { %v1409_v23 = vadd.f32 %v2473_v20, %v3023_v15 }
 0x2d4   :  { %v1400_v25 = vpop.f32.mrf.mxu0 }
 0x2d5   :  { %v2087_v14 = vpack.c.bf16 %v1409_v23, %v1406_v22  ;;  %v1401_v29 = vadd.f32 %v3023_v15, %v1400_v25 }
 0x2d6   :  { %v2476_v24 = vpop.f32.mrf.mxu0 }
 0x2d7   :  { %2135 = vst [vmem:[%s3192_s7 + $0xd8] sm:$0xff] %v2087_v14   ;;  %v2082_v51 = vpack.c.bf16 %v1401_v29, %v1398_v27  ;;  %v1422_v62 = vadd.f32 %v2476_v24, %v3023_v15 }
 0x2d8   :  { %v1413_v30 = vpop.f32.mrf.mxu0 }
 0x2d9   :  { %2134 = vst [vmem:[%s3192_s7 + $0xd0] sm:$0xff] %v2082_v51   ;;  %v1414_v33 = vadd.f32 %v3023_v15, %v1413_v30 }
 0x2da   :  { %v2477_v21 = vpop.f32.mrf.mxu0 }
 0x2db   :  { %v1425_v31 = vadd.f32 %v2477_v21, %v3023_v15 }
 0x2dc   :  { %v1416_v32 = vpop.f32.mrf.mxu0 }
 0x2dd   :  { %v2097_v35 = vpack.c.bf16 %v1425_v31, %v1422_v62  ;;  %v1417_v37 = vadd.f32 %v3023_v15, %v1416_v32 }
 0x2de   :  { %v2480_v38 = vpop.f32.mrf.mxu0 }
 0x2df   :  { %2137 = vst [vmem:[%s3192_s7 + $0xe8] sm:$0xff] %v2097_v35   ;;  %v2092_v39 = vpack.c.bf16 %v1417_v37, %v1414_v33  ;;  %v1438_v50 = vadd.f32 %v2480_v38, %v3023_v15 }
 0x2e0   :  { %v1429_v40 = vpop.f32.mrf.mxu0 }
 0x2e1   :  { %2136 = vst [vmem:[%s3192_s7 + $0xe0] sm:$0xff] %v2092_v39   ;;  %v1430_v43 = vadd.f32 %v3023_v15, %v1429_v40 }
 0x2e2   :  { %v2481_v34 = vpop.f32.mrf.mxu0 }
 0x2e3   :  { %v1441_v42 = vadd.f32 %v2481_v34, %v3023_v15 }
 0x2e4   :  { %v1432_v8 = vpop.f32.mrf.mxu0 }
 0x2e5   :  { %v2107_v45 = vpack.c.bf16 %v1441_v42, %v1438_v50  ;;  %v1433_v47 = vadd.f32 %v3023_v15, %v1432_v8 }
 0x2e7   :  { %2139 = vst [vmem:[%s3192_s7 + $0xf8] sm:$0xff] %v2107_v45   ;;  %v2102_v44 = vpack.c.bf16 %v1433_v47, %v1430_v43 }
 0x2e9   :  { %2138 = vst [vmem:[%s3192_s7 + $0xf0] sm:$0xff] %v2102_v44  }

</bundles_post_ra>
